<compile_context>
chip_gen: v7x
topology: tpu7x:2x2x1
jax: 0.10.0
libtpu: 0.0.40
codegen_flags: <defaults>
</compile_context>

<pallas_src>
import functools
import numpy as np

import jax
import jax.numpy as jnp
from jax import lax
from jax.experimental import pallas as pl
from jax.experimental.pallas import tpu as pltpu


# ---------------- config (stand-in for config/config.yaml) ----------------
NUM_CLASSES = 5
CONFIG = {
    "num_anchors": 3,
    "sample_rate": 800,
    "new_sample_rate": 800,      # == sample_rate -> Resample is identity
    "sample_duration": 2.0,      # seconds -> L = 1600 samples
    "taper_input": True,
    "taper_window": "hann",
    "scale_input": True,
    "anchors": {"sm": [0.10, 0.15, 0.20],
                "md": [0.30, 0.40, 0.50],
                "lg": [0.80, 1.00, 1.20]},
    "n_fft": 64,
    "hop_length": 32,
    "n_mels": 64,
    "n_mfcc": 64,
    "grid_sizes": {"sm": 16, "md": 8, "lg": 4},
}
TOP_DB = 80.0
AMIN = 1e-10
SCALE_EPS = 1e-5
_TEN_OVER_LN10 = float(10.0 / np.log(10.0))
LANES = 128


# ---------------- deterministic constant-matrix construction (numpy) ----------------
def _hann_np(n, periodic):
    denom = n if periodic else (n - 1)
    return 0.5 * (1.0 - np.cos(2.0 * np.pi * np.arange(n) / denom))


def _mel_filterbank_np(n_freqs, n_mels, sample_rate):
    # torchaudio.functional.melscale_fbanks, mel_scale='htk', norm=None
    f_min, f_max = 0.0, float(sample_rate // 2)
    hz2mel = lambda f: 2595.0 * np.log10(1.0 + f / 700.0)
    mel2hz = lambda m: 700.0 * (10.0 ** (m / 2595.0) - 1.0)
    all_freqs = np.linspace(0.0, sample_rate // 2, n_freqs)
    m_pts = np.linspace(hz2mel(f_min), hz2mel(f_max), n_mels + 2)
    f_pts = mel2hz(m_pts)
    f_diff = f_pts[1:] - f_pts[:-1]
    slopes = f_pts[None, :] - all_freqs[:, None]
    down = -slopes[:, :-2] / f_diff[:-1]
    up = slopes[:, 2:] / f_diff[1:]
    return np.maximum(0.0, np.minimum(down, up))                  # (n_freqs, n_mels)


def _dct_matrix_np(n_mfcc, n_mels):
    # torchaudio.functional.create_dct, norm='ortho' -> (n_mels, n_mfcc)
    n = np.arange(n_mels, dtype=np.float64)
    k = np.arange(n_mfcc, dtype=np.float64)[:, None]
    dct = np.cos(np.pi / n_mels * (n + 0.5) * k)
    dct[0] *= 1.0 / np.sqrt(2.0)
    dct *= np.sqrt(2.0 / n_mels)
    return dct.T


def _dft_window_matrix_np(n_fft, lane_width=LANES):
    """Hann(periodic) window folded into cos|sin DFT, packed lane-dense (n_fft, 128)."""
    n_freq = n_fft // 2 + 1
    half = lane_width // 2
    assert n_freq <= half
    win = _hann_np(n_fft, periodic=True)[:, None]
    n = np.arange(n_fft)[:, None]
    k = np.arange(n_freq)[None, :]
    ang = 2.0 * np.pi * n * k / n_fft
    m = np.zeros((n_fft, lane_width), np.float64)
    m[:, :n_freq] = win * np.cos(ang)
    m[:, half:half + n_freq] = -(win * np.sin(ang))
    return m.astype(np.float32)


def _mel_fb_padded_np(n_fft, n_mels, sample_rate, rows):
    n_freq = n_fft // 2 + 1
    out = np.zeros((rows, n_mels), np.float32)
    out[:n_freq] = _mel_filterbank_np(n_freq, n_mels, sample_rate)
    return out


def _pool_matrix_np(t_valid, t_pad, grid_sizes):
    """Stacked per-scale average-pooling matrix (sum g_pad, t_pad); rows 8-aligned."""
    offs, gpads, off = [], [], 0
    for g in grid_sizes:
        gp = int(np.ceil(g / 8) * 8)
        offs.append(off)
        gpads.append(gp)
        off += gp
    P = np.zeros((off, t_pad), np.float32)
    for g, o in zip(grid_sizes, offs):
        tper = t_valid // g                              # synthetic backbone pooling
        for j in range(g):
            P[o + j, j * tper:(j + 1) * tper] = 1.0 / tper
    return P, offs, gpads


# ---------------- parameters ----------------
def init_params(key):
    """Xavier-uniform linear heads (bias=0.01, like xavier_init_weights) + anchors."""
    feat_dim = 2 * CONFIG["n_mels"]
    out_ch = CONFIG["num_anchors"] * (3 + NUM_CLASSES)
    params = {}
    for name in ("sm", "md", "lg"):
        key, k = jax.random.split(key)
        bound = float(np.sqrt(6.0 / (feat_dim + out_ch)))
        w = jax.random.uniform(k, (feat_dim, out_ch), jnp.float32, -bound, bound)
        b = jnp.full((1, out_ch), 0.01, jnp.float32)
        # get_scale_pred receives (anchors / sample_duration) * sample_duration == anchors
        anc = jnp.asarray(CONFIG["anchors"][name], jnp.float32)      # (A,)
        params[name] = (w, b, anc)
    return params


# ---------------- fully fused Pallas kernel ----------------
def _fused_forward_kernel(frames_ref, dft_ref, fb_ref, dct_ref, pool_ref,
                          w_ref, b_ref, anc_ref,
                          sm_ref, md_ref, lg_ref, *,
                          t_valid, n_mels, n_mfcc, num_classes,
                          scale_meta, center_scaler, sample_duration):
    k = 3 + num_classes
    half = dft_ref.shape[1] // 2

    # ---- windowed DFT (lane-dense, one MXU push) -> power -> mel power ----
    f = frames_ref[0]                                                    # (T_pad, n_fft)
    z = jnp.dot(f, dft_ref[...], preferred_element_type=jnp.float32)    # (T_pad, 128)
    re = z[:, :half]
    im = z[:, half:]
    power = re * re + im * im                                            # (T_pad, 64)
    mel = jnp.dot(power, fb_ref[...], preferred_element_type=jnp.float32)  # (T_pad, n_mels)

    t_pad = mel.shape[0]
    valid = lax.broadcasted_iota(jnp.int32, (t_pad, n_mels), 0) < t_valid  # mask pad rows

    def amp_to_db(x):
        return _TEN_OVER_LN10 * jnp.log(jnp.maximum(x, AMIN))

    def top_db_clamp(db):
        db_max = jnp.max(jnp.where(valid, db, -1e30))
        return jnp.maximum(db, db_max - TOP_DB)

    def scale_input(x, n_valid):                       # torch scale_input, unbiased std
        mu = jnp.sum(jnp.where(valid, x, 0.0)) / n_valid
        d = jnp.where(valid, x - mu, 0.0)
        var = jnp.sum(d * d) / (n_valid - 1)
        return (x - mu) / (jnp.sqrt(var) + SCALE_EPS)

    mel_db_raw = amp_to_db(mel)                                          # no top_db yet
    mel_norm = scale_input(top_db_clamp(mel_db_raw), t_valid * n_mels)

    # MFCC branch: torchaudio MFCC(log_mels=False) -> inner dB (no top_db) -> DCT;
    # then forward() applies power_to_db_tfmr(top_db=80) to the MFCC (reference does
    # this; negative DCT coefficients clamp at amin exactly like torch), then scale.
    mfcc = jnp.dot(mel_db_raw, dct_ref[...], preferred_element_type=jnp.float32)
    mfcc_norm = scale_input(top_db_clamp(amp_to_db(mfcc)), t_valid * n_mfcc)

    # ---- synthetic backbone: per-grid-cell time pooling as one matmul ----
    spect = jnp.concatenate([mel_norm, mfcc_norm], axis=-1)              # (T_pad, 2*n_mels)
    feats_all = jnp.dot(pool_ref[...], spect,
                        preferred_element_type=jnp.float32)              # (32, 2*n_mels)

    # ---- three scale heads + vectorized get_scale_pred decode ----
    out_refs = (sm_ref, md_ref, lg_ref)
    for s_idx, (g, g_pad, off, stride) in enumerate(scale_meta):
        feats = feats_all[off:off + g_pad]                               # (g_pad, F)
        zz = jnp.dot(feats, w_ref[s_idx],
                     preferred_element_type=jnp.float32) + b_ref[s_idx]  # (g_pad, A*k)
        col = lax.broadcasted_iota(jnp.int32, zz.shape, 1) % k
        is_tc = col == (k - 2)
        is_tw = col == (k - 1)
        rows = lax.broadcasted_iota(jnp.int32, zz.shape, 0).astype(jnp.float32)
        s2 = jax.nn.sigmoid(zz) * 2.0
        centers = jnp.clip((s2 - 0.5 + rows) * (float(stride) / center_scaler),
                           0.0, sample_duration)
        widths = jnp.clip(s2 * s2 * anc_ref[s_idx], 0.0, sample_duration)
        dec = jnp.where(is_tc, centers, jnp.where(is_tw, widths, zz))
        out_refs[s_idx][0] = dec[:g]


def fused_forward_pallas(frames, dft, fb, dct, pool, w_all, b_all, anc_all, *,
                         t_valid, grid_sizes, scale_meta, center_scaler):
    bc, t_pad, n_fft = frames.shape
    n_mels = fb.shape[1]
    n_mfcc = dct.shape[1]
    oc = w_all.shape[-1]

    kernel = functools.partial(
        _fused_forward_kernel,
        t_valid=t_valid, n_mels=n_mels, n_mfcc=n_mfcc, num_classes=NUM_CLASSES,
        scale_meta=tuple(scale_meta), center_scaler=center_scaler,
        sample_duration=CONFIG["sample_duration"])

    out_shape = tuple(jax.ShapeDtypeStruct((bc, g, oc), jnp.float32) for g in grid_sizes)
    out_specs = tuple(pl.BlockSpec((1, g, oc), lambda i: (i, 0, 0)) for g in grid_sizes)

    return pl.pallas_call(
        kernel,
        out_shape=out_shape,
        grid=(bc,),
        in_specs=[
            pl.BlockSpec((1, t_pad, n_fft), lambda i: (i, 0, 0)),
            pl.BlockSpec(dft.shape, lambda i: (0, 0)),
            pl.BlockSpec(fb.shape, lambda i: (0, 0)),
            pl.BlockSpec(dct.shape, lambda i: (0, 0)),
            pl.BlockSpec(pool.shape, lambda i: (0, 0)),
            pl.BlockSpec(w_all.shape, lambda i: (0, 0, 0)),
            pl.BlockSpec(b_all.shape, lambda i: (0, 0, 0)),
            pl.BlockSpec(anc_all.shape, lambda i: (0, 0, 0)),
        ],
        out_specs=out_specs,
        # batch axis parallel -> shards across the 2 TensorCores on v7x; neutral on v5e/v6e
        compiler_params=pltpu.CompilerParams(dimension_semantics=("parallel",)),
    )(frames, dft, fb, dct, pool, w_all, b_all, anc_all)


# ---------------- forward pass (thin glue + one fused kernel) ----------------
def audio_detection_forward(x, params):
    b, c, length = x.shape
    assert c == 1, "mono audio expected (backbone takes 2 spectral channels)"
    sr = CONFIG["new_sample_rate"]
    n_fft, hop = CONFIG["n_fft"], CONFIG["hop_length"]
    n_mels, n_mfcc = CONFIG["n_mels"], CONFIG["n_mfcc"]
    assert n_mels == n_mfcc

    x = x.astype(jnp.float32)
    # resampler: identity (orig_freq == new_freq)
    if CONFIG["taper_input"]:
        taper = jnp.asarray(_hann_np(length, periodic=False), jnp.float32)
        x = x * taper[None, None, :]

    # STFT framing (center=True, reflect pad); pad T=51 -> multiple of 8
    padded = jnp.pad(x, ((0, 0), (0, 0), (n_fft // 2, n_fft // 2)), mode="reflect")
    t_frames = 1 + length // hop
    t_pad = int(np.ceil(t_frames / 8) * 8)
    idx = np.arange(t_frames)[:, None] * hop + np.arange(n_fft)[None, :]
    frames = padded[:, :, idx].reshape(b * c, t_frames, n_fft)
    frames = jnp.pad(frames, ((0, 0), (0, t_pad - t_frames), (0, 0)))

    # constant matrices
    dft = jnp.asarray(_dft_window_matrix_np(n_fft))                  # (n_fft, 128)
    fb = jnp.asarray(_mel_fb_padded_np(n_fft, n_mels, sr, LANES // 2))  # (64, n_mels)
    dct = jnp.asarray(_dct_matrix_np(n_mfcc, n_mels))                # (n_mels, n_mfcc)

    grid_list = [CONFIG["grid_sizes"][n] for n in ("sm", "md", "lg")]
    pool_np, offs, gpads = _pool_matrix_np(t_frames, t_pad, grid_list)
    pool = jnp.asarray(pool_np)                                      # (32, t_pad)

    spectral_size = t_frames
    center_scaler = spectral_size / (length / sr)
    k = 3 + NUM_CLASSES
    a = CONFIG["num_anchors"]

    # stack head params; broadcast anchors to per-output-column values
    names = ("sm", "md", "lg")
    w_all = jnp.stack([params[n][0] for n in names], axis=0)            # (3, F, A*k)
    b_all = jnp.stack([params[n][1] for n in names], axis=0)            # (3, 1, A*k)
    anc_all = jnp.stack([jnp.repeat(params[n][2], k)[None, :] for n in names],
                        axis=0)                                         # (3, 1, A*k)

    # stride uses integer floor exactly like the torch module
    scale_meta = tuple((g, gp, off, spectral_size // g)
                       for g, gp, off in zip(grid_list, gpads, offs))

    outs = fused_forward_pallas(
        frames, dft, fb, dct, pool, w_all, b_all, anc_all,
        t_valid=t_frames, grid_sizes=grid_list, scale_meta=scale_meta,
        center_scaler=center_scaler)

    return tuple(o.reshape(b, g, a, k) for o, g in zip(outs, grid_list))


# ---------------- main ----------------
if __name__ == "__main__":
    key = jax.random.PRNGKey(0)
    kx, kp = jax.random.split(key)
    L = int(CONFIG["sample_rate"] * CONFIG["sample_duration"])   # 1600
    x = 0.1 * jax.random.normal(kx, (2, 1, L), jnp.float32)
    params = init_params(kp)

    fwd = jax.jit(audio_detection_forward)
    sm_preds, md_preds, lg_preds = fwd(x, params)
    jax.block_until_ready((sm_preds, md_preds, lg_preds))

    assert sm_preds.shape == (2, CONFIG["grid_sizes"]["sm"], 3, 3 + NUM_CLASSES)
    assert md_preds.shape == (2, CONFIG["grid_sizes"]["md"], 3, 3 + NUM_CLASSES)
    assert lg_preds.shape == (2, CONFIG["grid_sizes"]["lg"], 3, 3 + NUM_CLASSES)
    assert bool(jnp.all(jnp.isfinite(sm_preds)))
    assert bool(jnp.all(jnp.isfinite(md_preds)))
    assert bool(jnp.all(jnp.isfinite(lg_preds)))
    print("KERNEL_OK")
</pallas_src>

<mosaic_0001>
module attributes {stable_mosaic.version = 11 : i64} {
  func.func private @main(%arg0: i32) attributes {dimension_semantics = [#tpu.dimension_semantics<core_parallel>], iteration_bounds = array<i64: 2>, tpu.core_type = #tpu.core_type<sc_scalar_subcore>, window_params = []} {
    return
  }
}

module attributes {stable_mosaic.version = 11 : i64} {
  func.func private @main(%arg0: i32) attributes {dimension_semantics = [#tpu.dimension_semantics<core_parallel>], iteration_bounds = array<i64: 2>, tpu.core_type = #tpu.core_type<sc_scalar_subcore>, window_params = []} {
    return
  }
}

module attributes {stable_mosaic.version = 11 : i64} {
  func.func @_fused_forward_kernel(%arg0: i32, %arg1: memref<1x56x64xf32, #tpu.memory_space<vmem>>, %arg2: memref<64x128xf32, #tpu.memory_space<vmem>>, %arg3: memref<64x64xf32, #tpu.memory_space<vmem>>, %arg4: memref<64x64xf32, #tpu.memory_space<vmem>>, %arg5: memref<32x56xf32, #tpu.memory_space<vmem>>, %arg6: memref<3x128x24xf32, #tpu.memory_space<vmem>>, %arg7: memref<3x1x24xf32, #tpu.memory_space<vmem>>, %arg8: memref<3x1x24xf32, #tpu.memory_space<vmem>>, %arg9: memref<1x16x24xf32, #tpu.memory_space<vmem>>, %arg10: memref<1x8x24xf32, #tpu.memory_space<vmem>>, %arg11: memref<1x4x24xf32, #tpu.memory_space<vmem>>) attributes {dimension_semantics = [#tpu.dimension_semantics<parallel>], iteration_bounds = array<i64: 2>, scalar_prefetch = 0 : i64, scratch_operands = 0 : i64, tpu.core_type = #tpu.core_type<tc>, window_params = [{transform_indices = @transform_0, window_bounds = array<i64: 1, 56, 64>}, {pipeline_mode = #tpu.pipeline_mode<synchronous>, transform_indices = @transform_1, window_bounds = array<i64: 64, 128>}, {pipeline_mode = #tpu.pipeline_mode<synchronous>, transform_indices = @transform_2, window_bounds = array<i64: 64, 64>}, {pipeline_mode = #tpu.pipeline_mode<synchronous>, transform_indices = @transform_3, window_bounds = array<i64: 64, 64>}, {pipeline_mode = #tpu.pipeline_mode<synchronous>, transform_indices = @transform_4, window_bounds = array<i64: 32, 56>}, {pipeline_mode = #tpu.pipeline_mode<synchronous>, transform_indices = @transform_5, window_bounds = array<i64: 3, 128, 24>}, {pipeline_mode = #tpu.pipeline_mode<synchronous>, transform_indices = @transform_6, window_bounds = array<i64: 3, 1, 24>}, {pipeline_mode = #tpu.pipeline_mode<synchronous>, transform_indices = @transform_7, window_bounds = array<i64: 3, 1, 24>}, {transform_indices = @transform_8, window_bounds = array<i64: 1, 16, 24>}, {transform_indices = @transform_9, window_bounds = array<i64: 1, 8, 24>}, {transform_indices = @transform_10, window_bounds = array<i64: 1, 4, 24>}]} {
    %c0 = arith.constant 0 : index
    %c0_0 = arith.constant 0 : index
    %c0_1 = arith.constant 0 : index
    %0 = vector.load %arg1[%c0, %c0_0, %c0_1] : memref<1x56x64xf32, #tpu.memory_space<vmem>>, vector<1x56x64xf32>
    %1 = vector.shape_cast %0 : vector<1x56x64xf32> to vector<56x64xf32>
    %c0_2 = arith.constant 0 : index
    %c0_3 = arith.constant 0 : index
    %2 = vector.load %arg2[%c0_2, %c0_3] : memref<64x128xf32, #tpu.memory_space<vmem>>, vector<64x128xf32>
    %cst = arith.constant dense<0.000000e+00> : vector<56x128xf32>
    %3 = tpu.matmul %1, %2, %cst {dimension_numbers = #tpu.dot_dimension_numbers<[1], [0], [0], [1], [0, 0, 1, 1], [], []>} : vector<56x64xf32>, vector<64x128xf32>, vector<56x128xf32> -> vector<56x128xf32>
    %4 = vector.extract_strided_slice %3 {offsets = [0, 0], sizes = [56, 64], strides = [1, 1]} : vector<56x128xf32> to vector<56x64xf32>
    %5 = vector.extract_strided_slice %3 {offsets = [0, 64], sizes = [56, 64], strides = [1, 1]} : vector<56x128xf32> to vector<56x64xf32>
    %6 = arith.mulf %4, %4 : vector<56x64xf32>
    %7 = arith.mulf %5, %5 : vector<56x64xf32>
    %8 = arith.addf %6, %7 : vector<56x64xf32>
    %c0_4 = arith.constant 0 : index
    %c0_5 = arith.constant 0 : index
    %9 = vector.load %arg3[%c0_4, %c0_5] : memref<64x64xf32, #tpu.memory_space<vmem>>, vector<64x64xf32>
    %cst_6 = arith.constant dense<0.000000e+00> : vector<56x64xf32>
    %10 = tpu.matmul %8, %9, %cst_6 {dimension_numbers = #tpu.dot_dimension_numbers<[1], [0], [0], [1], [0, 0, 1, 1], [], []>} : vector<56x64xf32>, vector<64x64xf32>, vector<56x64xf32> -> vector<56x64xf32>
    %11 = tpu.iota {dimensions = array<i32: 0>} : vector<56x64xi32>
    %c51_i32 = arith.constant 51 : i32
    %12 = vector.broadcast %c51_i32 : i32 to vector<56x64xi32>
    %13 = arith.cmpi slt, %11, %12 : vector<56x64xi32>
    %cst_7 = arith.constant 1.000000e-10 : f32
    %14 = vector.broadcast %cst_7 : f32 to vector<56x64xf32>
    %15 = arith.maximumf %10, %14 : vector<56x64xf32>
    %16 = math.log %15 : vector<56x64xf32>
    %cst_8 = arith.constant 4.34294462 : f32
    %17 = vector.broadcast %cst_8 : f32 to vector<56x64xf32>
    %18 = arith.mulf %17, %16 : vector<56x64xf32>
    %cst_9 = arith.constant -1.000000e+30 : f32
    %19 = vector.broadcast %cst_9 : f32 to vector<56x64xf32>
    %20 = arith.select %13, %18, %19 : vector<56x64xi1>, vector<56x64xf32>
    %21 = vector.shape_cast %20 : vector<56x64xf32> to vector<1x56x64xf32>
    %cst_10 = arith.constant dense<0xFF800000> : vector<1xf32>
    %22 = vector.multi_reduction <maximumf>, %21, %cst_10 [1, 2] : vector<1x56x64xf32> to vector<1xf32>
    %23 = vector.shape_cast %22 : vector<1xf32> to vector<1x1x1xf32>
    %24 = vector.extract %23[0, 0, 0] : f32 from vector<1x1x1xf32>
    %cst_11 = arith.constant 8.000000e+01 : f32
    %25 = arith.subf %24, %cst_11 : f32
    %26 = vector.broadcast %25 : f32 to vector<56x64xf32>
    %27 = arith.maximumf %18, %26 : vector<56x64xf32>
    %cst_12 = arith.constant 0.000000e+00 : f32
    %28 = vector.broadcast %cst_12 : f32 to vector<56x64xf32>
    %29 = arith.select %13, %27, %28 : vector<56x64xi1>, vector<56x64xf32>
    %30 = vector.shape_cast %29 : vector<56x64xf32> to vector<1x56x64xf32>
    %cst_13 = arith.constant dense<0.000000e+00> : vector<1xf32>
    %31 = vector.multi_reduction <add>, %30, %cst_13 [1, 2] : vector<1x56x64xf32> to vector<1xf32>
    %32 = vector.shape_cast %31 : vector<1xf32> to vector<1x1x1xf32>
    %33 = vector.extract %32[0, 0, 0] : f32 from vector<1x1x1xf32>
    %cst_14 = arith.constant 3.264000e+03 : f32
    %34 = arith.divf %33, %cst_14 : f32
    %35 = vector.broadcast %34 : f32 to vector<56x64xf32>
    %36 = arith.subf %27, %35 : vector<56x64xf32>
    %cst_15 = arith.constant 0.000000e+00 : f32
    %37 = vector.broadcast %cst_15 : f32 to vector<56x64xf32>
    %38 = arith.select %13, %36, %37 : vector<56x64xi1>, vector<56x64xf32>
    %39 = arith.mulf %38, %38 : vector<56x64xf32>
    %40 = vector.shape_cast %39 : vector<56x64xf32> to vector<1x56x64xf32>
    %cst_16 = arith.constant dense<0.000000e+00> : vector<1xf32>
    %41 = vector.multi_reduction <add>, %40, %cst_16 [1, 2] : vector<1x56x64xf32> to vector<1xf32>
    %42 = vector.shape_cast %41 : vector<1xf32> to vector<1x1x1xf32>
    %43 = vector.extract %42[0, 0, 0] : f32 from vector<1x1x1xf32>
    %cst_17 = arith.constant 3.263000e+03 : f32
    %44 = arith.divf %43, %cst_17 : f32
    %45 = vector.broadcast %34 : f32 to vector<56x64xf32>
    %46 = arith.subf %27, %45 : vector<56x64xf32>
    %47 = math.sqrt %44 : f32
    %cst_18 = arith.constant 9.99999974E-6 : f32
    %48 = arith.addf %47, %cst_18 : f32
    %49 = vector.broadcast %48 : f32 to vector<56x64xf32>
    %50 = arith.divf %46, %49 : vector<56x64xf32>
    %c0_19 = arith.constant 0 : index
    %c0_20 = arith.constant 0 : index
    %51 = vector.load %arg4[%c0_19, %c0_20] : memref<64x64xf32, #tpu.memory_space<vmem>>, vector<64x64xf32>
    %cst_21 = arith.constant dense<0.000000e+00> : vector<56x64xf32>
    %52 = tpu.matmul %18, %51, %cst_21 {dimension_numbers = #tpu.dot_dimension_numbers<[1], [0], [0], [1], [0, 0, 1, 1], [], []>} : vector<56x64xf32>, vector<64x64xf32>, vector<56x64xf32> -> vector<56x64xf32>
    %cst_22 = arith.constant 1.000000e-10 : f32
    %53 = vector.broadcast %cst_22 : f32 to vector<56x64xf32>
    %54 = arith.maximumf %52, %53 : vector<56x64xf32>
    %55 = math.log %54 : vector<56x64xf32>
    %cst_23 = arith.constant 4.34294462 : f32
    %56 = vector.broadcast %cst_23 : f32 to vector<56x64xf32>
    %57 = arith.mulf %56, %55 : vector<56x64xf32>
    %cst_24 = arith.constant -1.000000e+30 : f32
    %58 = vector.broadcast %cst_24 : f32 to vector<56x64xf32>
    %59 = arith.select %13, %57, %58 : vector<56x64xi1>, vector<56x64xf32>
    %60 = vector.shape_cast %59 : vector<56x64xf32> to vector<1x56x64xf32>
    %cst_25 = arith.constant dense<0xFF800000> : vector<1xf32>
    %61 = vector.multi_reduction <maximumf>, %60, %cst_25 [1, 2] : vector<1x56x64xf32> to vector<1xf32>
    %62 = vector.shape_cast %61 : vector<1xf32> to vector<1x1x1xf32>
    %63 = vector.extract %62[0, 0, 0] : f32 from vector<1x1x1xf32>
    %cst_26 = arith.constant 8.000000e+01 : f32
    %64 = arith.subf %63, %cst_26 : f32
    %65 = vector.broadcast %64 : f32 to vector<56x64xf32>
    %66 = arith.maximumf %57, %65 : vector<56x64xf32>
    %cst_27 = arith.constant 0.000000e+00 : f32
    %67 = vector.broadcast %cst_27 : f32 to vector<56x64xf32>
    %68 = arith.select %13, %66, %67 : vector<56x64xi1>, vector<56x64xf32>
    %69 = vector.shape_cast %68 : vector<56x64xf32> to vector<1x56x64xf32>
    %cst_28 = arith.constant dense<0.000000e+00> : vector<1xf32>
    %70 = vector.multi_reduction <add>, %69, %cst_28 [1, 2] : vector<1x56x64xf32> to vector<1xf32>
    %71 = vector.shape_cast %70 : vector<1xf32> to vector<1x1x1xf32>
    %72 = vector.extract %71[0, 0, 0] : f32 from vector<1x1x1xf32>
    %cst_29 = arith.constant 3.264000e+03 : f32
    %73 = arith.divf %72, %cst_29 : f32
    %74 = vector.broadcast %73 : f32 to vector<56x64xf32>
    %75 = arith.subf %66, %74 : vector<56x64xf32>
    %cst_30 = arith.constant 0.000000e+00 : f32
    %76 = vector.broadcast %cst_30 : f32 to vector<56x64xf32>
    %77 = arith.select %13, %75, %76 : vector<56x64xi1>, vector<56x64xf32>
    %78 = arith.mulf %77, %77 : vector<56x64xf32>
    %79 = vector.shape_cast %78 : vector<56x64xf32> to vector<1x56x64xf32>
    %cst_31 = arith.constant dense<0.000000e+00> : vector<1xf32>
    %80 = vector.multi_reduction <add>, %79, %cst_31 [1, 2] : vector<1x56x64xf32> to vector<1xf32>
    %81 = vector.shape_cast %80 : vector<1xf32> to vector<1x1x1xf32>
    %82 = vector.extract %81[0, 0, 0] : f32 from vector<1x1x1xf32>
    %cst_32 = arith.constant 3.263000e+03 : f32
    %83 = arith.divf %82, %cst_32 : f32
    %84 = vector.broadcast %73 : f32 to vector<56x64xf32>
    %85 = arith.subf %66, %84 : vector<56x64xf32>
    %86 = math.sqrt %83 : f32
    %cst_33 = arith.constant 9.99999974E-6 : f32
    %87 = arith.addf %86, %cst_33 : f32
    %88 = vector.broadcast %87 : f32 to vector<56x64xf32>
    %89 = arith.divf %85, %88 : vector<56x64xf32>
    %90 = tpu.concatenate %50, %89 in 1 : vector<56x64xf32>, vector<56x64xf32> -> vector<56x128xf32>
    %c0_34 = arith.constant 0 : index
    %c0_35 = arith.constant 0 : index
    %91 = vector.load %arg5[%c0_34, %c0_35] : memref<32x56xf32, #tpu.memory_space<vmem>>, vector<32x56xf32>
    %cst_36 = arith.constant dense<0.000000e+00> : vector<32x128xf32>
    %92 = tpu.matmul %91, %90, %cst_36 {dimension_numbers = #tpu.dot_dimension_numbers<[1], [0], [0], [1], [0, 0, 1, 1], [], []>} : vector<32x56xf32>, vector<56x128xf32>, vector<32x128xf32> -> vector<32x128xf32>
    %93 = vector.extract_strided_slice %92 {offsets = [0, 0], sizes = [16, 128], strides = [1, 1]} : vector<32x128xf32> to vector<16x128xf32>
    %c0_37 = arith.constant 0 : index
    %c0_38 = arith.constant 0 : index
    %c0_39 = arith.constant 0 : index
    %94 = vector.load %arg6[%c0_37, %c0_38, %c0_39] : memref<3x128x24xf32, #tpu.memory_space<vmem>>, vector<1x128x24xf32>
    %95 = vector.shape_cast %94 : vector<1x128x24xf32> to vector<128x24xf32>
    %cst_40 = arith.constant dense<0.000000e+00> : vector<16x24xf32>
    %96 = tpu.matmul %93, %95, %cst_40 {dimension_numbers = #tpu.dot_dimension_numbers<[1], [0], [0], [1], [0, 0, 1, 1], [], []>} : vector<16x128xf32>, vector<128x24xf32>, vector<16x24xf32> -> vector<16x24xf32>
    %c0_41 = arith.constant 0 : index
    %c0_42 = arith.constant 0 : index
    %c0_43 = arith.constant 0 : index
    %97 = vector.load %arg7[%c0_41, %c0_42, %c0_43] : memref<3x1x24xf32, #tpu.memory_space<vmem>>, vector<1x1x24xf32>
    %98 = vector.shape_cast %97 : vector<1x1x24xf32> to vector<1x24xf32>
    %99 = vector.broadcast %98 : vector<1x24xf32> to vector<16x24xf32>
    %100 = arith.addf %96, %99 : vector<16x24xf32>
    %101 = tpu.iota {dimensions = array<i32: 1>} : vector<16x24xi32>
    %c8_i32 = arith.constant 8 : i32
    %c0_i32 = arith.constant 0 : i32
    %102 = arith.cmpi eq, %c8_i32, %c0_i32 : i32
    %c1_i32 = arith.constant 1 : i32
    %103 = arith.select %102, %c1_i32, %c8_i32 : i32
    %104 = vector.broadcast %103 : i32 to vector<16x24xi32>
    %105 = arith.remsi %101, %104 : vector<16x24xi32>
    %c0_i32_44 = arith.constant 0 : i32
    %106 = vector.broadcast %c0_i32_44 : i32 to vector<16x24xi32>
    %107 = arith.cmpi ne, %105, %106 : vector<16x24xi32>
    %c0_i32_45 = arith.constant 0 : i32
    %108 = vector.broadcast %c0_i32_45 : i32 to vector<16x24xi32>
    %109 = arith.cmpi slt, %105, %108 : vector<16x24xi32>
    %c0_i32_46 = arith.constant 0 : i32
    %110 = arith.cmpi slt, %103, %c0_i32_46 : i32
    %111 = vector.broadcast %110 : i1 to vector<16x24xi1>
    %112 = vector.broadcast %111 : vector<16x24xi1> to vector<16x24xi1>
    %113 = arith.xori %109, %112 : vector<16x24xi1>
    %114 = arith.andi %113, %107 : vector<16x24xi1>
    %115 = vector.broadcast %103 : i32 to vector<16x24xi32>
    %116 = arith.addi %105, %115 : vector<16x24xi32>
    %117 = arith.select %114, %116, %105 : vector<16x24xi1>, vector<16x24xi32>
    %c6_i32 = arith.constant 6 : i32
    %118 = vector.broadcast %c6_i32 : i32 to vector<16x24xi32>
    %119 = arith.cmpi eq, %117, %118 : vector<16x24xi32>
    %c7_i32 = arith.constant 7 : i32
    %120 = vector.broadcast %c7_i32 : i32 to vector<16x24xi32>
    %121 = arith.cmpi eq, %117, %120 : vector<16x24xi32>
    %122 = tpu.iota {dimensions = array<i32: 0>} : vector<16x24xi32>
    %123 = arith.sitofp %122 : vector<16x24xi32> to vector<16x24xf32>
    %124 = arith.negf %100 : vector<16x24xf32>
    %125 = math.exp %124 : vector<16x24xf32>
    %cst_47 = arith.constant 1.000000e+00 : f32
    %126 = vector.broadcast %cst_47 : f32 to vector<16x24xf32>
    %127 = arith.addf %126, %125 : vector<16x24xf32>
    %128 = arith.divf %126, %127 : vector<16x24xf32>
    %cst_48 = arith.constant 2.000000e+00 : f32
    %129 = vector.broadcast %cst_48 : f32 to vector<16x24xf32>
    %130 = arith.mulf %128, %129 : vector<16x24xf32>
    %cst_49 = arith.constant 5.000000e-01 : f32
    %131 = vector.broadcast %cst_49 : f32 to vector<16x24xf32>
    %132 = arith.subf %130, %131 : vector<16x24xf32>
    %133 = arith.addf %132, %123 : vector<16x24xf32>
    %cst_50 = arith.constant 0.117647059 : f32
    %134 = vector.broadcast %cst_50 : f32 to vector<16x24xf32>
    %135 = arith.mulf %133, %134 : vector<16x24xf32>
    %cst_51 = arith.constant 0.000000e+00 : f32
    %cst_52 = arith.constant 2.000000e+00 : f32
    %136 = vector.broadcast %cst_51 : f32 to vector<16x24xf32>
    %137 = arith.maximumf %136, %135 : vector<16x24xf32>
    %138 = vector.broadcast %cst_52 : f32 to vector<16x24xf32>
    %139 = arith.minimumf %138, %137 : vector<16x24xf32>
    %140 = arith.mulf %130, %130 : vector<16x24xf32>
    %c0_53 = arith.constant 0 : index
    %c0_54 = arith.constant 0 : index
    %c0_55 = arith.constant 0 : index
    %141 = vector.load %arg8[%c0_53, %c0_54, %c0_55] : memref<3x1x24xf32, #tpu.memory_space<vmem>>, vector<1x1x24xf32>
    %142 = vector.shape_cast %141 : vector<1x1x24xf32> to vector<1x24xf32>
    %143 = vector.broadcast %142 : vector<1x24xf32> to vector<16x24xf32>
    %144 = arith.mulf %140, %143 : vector<16x24xf32>
    %cst_56 = arith.constant 0.000000e+00 : f32
    %cst_57 = arith.constant 2.000000e+00 : f32
    %145 = vector.broadcast %cst_56 : f32 to vector<16x24xf32>
    %146 = arith.maximumf %145, %144 : vector<16x24xf32>
    %147 = vector.broadcast %cst_57 : f32 to vector<16x24xf32>
    %148 = arith.minimumf %147, %146 : vector<16x24xf32>
    %149 = arith.select %121, %148, %100 : vector<16x24xi1>, vector<16x24xf32>
    %150 = arith.select %119, %139, %149 : vector<16x24xi1>, vector<16x24xf32>
    %c0_58 = arith.constant 0 : index
    %c0_59 = arith.constant 0 : index
    %c0_60 = arith.constant 0 : index
    %151 = vector.load %arg9[%c0_58, %c0_59, %c0_60] : memref<1x16x24xf32, #tpu.memory_space<vmem>>, vector<1x16x24xf32>
    %152 = vector.shape_cast %151 : vector<1x16x24xf32> to vector<16x24xf32>
    %153 = vector.shape_cast %150 : vector<16x24xf32> to vector<1x16x24xf32>
    tpu.vector_store %arg9[%c0_58, %c0_59, %c0_60], %153 {strides = array<i32>} : memref<1x16x24xf32, #tpu.memory_space<vmem>>, vector<1x16x24xf32>,
    %154 = vector.extract_strided_slice %92 {offsets = [16, 0], sizes = [8, 128], strides = [1, 1]} : vector<32x128xf32> to vector<8x128xf32>
    %c1 = arith.constant 1 : index
    %c0_61 = arith.constant 0 : index
    %c0_62 = arith.constant 0 : index
    %155 = vector.load %arg6[%c1, %c0_61, %c0_62] : memref<3x128x24xf32, #tpu.memory_space<vmem>>, vector<1x128x24xf32>
    %156 = vector.shape_cast %155 : vector<1x128x24xf32> to vector<128x24xf32>
    %cst_63 = arith.constant dense<0.000000e+00> : vector<8x24xf32>
    %157 = tpu.matmul %154, %156, %cst_63 {dimension_numbers = #tpu.dot_dimension_numbers<[1], [0], [0], [1], [0, 0, 1, 1], [], []>} : vector<8x128xf32>, vector<128x24xf32>, vector<8x24xf32> -> vector<8x24xf32>
    %c1_64 = arith.constant 1 : index
    %c0_65 = arith.constant 0 : index
    %c0_66 = arith.constant 0 : index
    %158 = vector.load %arg7[%c1_64, %c0_65, %c0_66] : memref<3x1x24xf32, #tpu.memory_space<vmem>>, vector<1x1x24xf32>
    %159 = vector.shape_cast %158 : vector<1x1x24xf32> to vector<1x24xf32>
    %160 = vector.broadcast %159 : vector<1x24xf32> to vector<8x24xf32>
    %161 = arith.addf %157, %160 : vector<8x24xf32>
    %162 = tpu.iota {dimensions = array<i32: 1>} : vector<8x24xi32>
    %c8_i32_67 = arith.constant 8 : i32
    %c0_i32_68 = arith.constant 0 : i32
    %163 = arith.cmpi eq, %c8_i32_67, %c0_i32_68 : i32
    %c1_i32_69 = arith.constant 1 : i32
    %164 = arith.select %163, %c1_i32_69, %c8_i32_67 : i32
    %165 = vector.broadcast %164 : i32 to vector<8x24xi32>
    %166 = arith.remsi %162, %165 : vector<8x24xi32>
    %c0_i32_70 = arith.constant 0 : i32
    %167 = vector.broadcast %c0_i32_70 : i32 to vector<8x24xi32>
    %168 = arith.cmpi ne, %166, %167 : vector<8x24xi32>
    %c0_i32_71 = arith.constant 0 : i32
    %169 = vector.broadcast %c0_i32_71 : i32 to vector<8x24xi32>
    %170 = arith.cmpi slt, %166, %169 : vector<8x24xi32>
    %c0_i32_72 = arith.constant 0 : i32
    %171 = arith.cmpi slt, %164, %c0_i32_72 : i32
    %172 = vector.broadcast %171 : i1 to vector<8x24xi1>
    %173 = vector.broadcast %172 : vector<8x24xi1> to vector<8x24xi1>
    %174 = arith.xori %170, %173 : vector<8x24xi1>
    %175 = arith.andi %174, %168 : vector<8x24xi1>
    %176 = vector.broadcast %164 : i32 to vector<8x24xi32>
    %177 = arith.addi %166, %176 : vector<8x24xi32>
    %178 = arith.select %175, %177, %166 : vector<8x24xi1>, vector<8x24xi32>
    %c6_i32_73 = arith.constant 6 : i32
    %179 = vector.broadcast %c6_i32_73 : i32 to vector<8x24xi32>
    %180 = arith.cmpi eq, %178, %179 : vector<8x24xi32>
    %c7_i32_74 = arith.constant 7 : i32
    %181 = vector.broadcast %c7_i32_74 : i32 to vector<8x24xi32>
    %182 = arith.cmpi eq, %178, %181 : vector<8x24xi32>
    %183 = tpu.iota {dimensions = array<i32: 0>} : vector<8x24xi32>
    %184 = arith.sitofp %183 : vector<8x24xi32> to vector<8x24xf32>
    %185 = arith.negf %161 : vector<8x24xf32>
    %186 = math.exp %185 : vector<8x24xf32>
    %cst_75 = arith.constant 1.000000e+00 : f32
    %187 = vector.broadcast %cst_75 : f32 to vector<8x24xf32>
    %188 = arith.addf %187, %186 : vector<8x24xf32>
    %189 = arith.divf %187, %188 : vector<8x24xf32>
    %cst_76 = arith.constant 2.000000e+00 : f32
    %190 = vector.broadcast %cst_76 : f32 to vector<8x24xf32>
    %191 = arith.mulf %189, %190 : vector<8x24xf32>
    %cst_77 = arith.constant 5.000000e-01 : f32
    %192 = vector.broadcast %cst_77 : f32 to vector<8x24xf32>
    %193 = arith.subf %191, %192 : vector<8x24xf32>
    %194 = arith.addf %193, %184 : vector<8x24xf32>
    %cst_78 = arith.constant 0.235294119 : f32
    %195 = vector.broadcast %cst_78 : f32 to vector<8x24xf32>
    %196 = arith.mulf %194, %195 : vector<8x24xf32>
    %cst_79 = arith.constant 0.000000e+00 : f32
    %cst_80 = arith.constant 2.000000e+00 : f32
    %197 = vector.broadcast %cst_79 : f32 to vector<8x24xf32>
    %198 = arith.maximumf %197, %196 : vector<8x24xf32>
    %199 = vector.broadcast %cst_80 : f32 to vector<8x24xf32>
    %200 = arith.minimumf %199, %198 : vector<8x24xf32>
    %201 = arith.mulf %191, %191 : vector<8x24xf32>
    %c1_81 = arith.constant 1 : index
    %c0_82 = arith.constant 0 : index
    %c0_83 = arith.constant 0 : index
    %202 = vector.load %arg8[%c1_81, %c0_82, %c0_83] : memref<3x1x24xf32, #tpu.memory_space<vmem>>, vector<1x1x24xf32>
    %203 = vector.shape_cast %202 : vector<1x1x24xf32> to vector<1x24xf32>
    %204 = vector.broadcast %203 : vector<1x24xf32> to vector<8x24xf32>
    %205 = arith.mulf %201, %204 : vector<8x24xf32>
    %cst_84 = arith.constant 0.000000e+00 : f32
    %cst_85 = arith.constant 2.000000e+00 : f32
    %206 = vector.broadcast %cst_84 : f32 to vector<8x24xf32>
    %207 = arith.maximumf %206, %205 : vector<8x24xf32>
    %208 = vector.broadcast %cst_85 : f32 to vector<8x24xf32>
    %209 = arith.minimumf %208, %207 : vector<8x24xf32>
    %210 = arith.select %182, %209, %161 : vector<8x24xi1>, vector<8x24xf32>
    %211 = arith.select %180, %200, %210 : vector<8x24xi1>, vector<8x24xf32>
    %c0_86 = arith.constant 0 : index
    %c0_87 = arith.constant 0 : index
    %c0_88 = arith.constant 0 : index
    %212 = vector.load %arg10[%c0_86, %c0_87, %c0_88] : memref<1x8x24xf32, #tpu.memory_space<vmem>>, vector<1x8x24xf32>
    %213 = vector.shape_cast %212 : vector<1x8x24xf32> to vector<8x24xf32>
    %214 = vector.shape_cast %211 : vector<8x24xf32> to vector<1x8x24xf32>
    tpu.vector_store %arg10[%c0_86, %c0_87, %c0_88], %214 {strides = array<i32>} : memref<1x8x24xf32, #tpu.memory_space<vmem>>, vector<1x8x24xf32>,
    %215 = vector.extract_strided_slice %92 {offsets = [24, 0], sizes = [8, 128], strides = [1, 1]} : vector<32x128xf32> to vector<8x128xf32>
    %c2 = arith.constant 2 : index
    %c0_89 = arith.constant 0 : index
    %c0_90 = arith.constant 0 : index
    %216 = vector.load %arg6[%c2, %c0_89, %c0_90] : memref<3x128x24xf32, #tpu.memory_space<vmem>>, vector<1x128x24xf32>
    %217 = vector.shape_cast %216 : vector<1x128x24xf32> to vector<128x24xf32>
    %cst_91 = arith.constant dense<0.000000e+00> : vector<8x24xf32>
    %218 = tpu.matmul %215, %217, %cst_91 {dimension_numbers = #tpu.dot_dimension_numbers<[1], [0], [0], [1], [0, 0, 1, 1], [], []>} : vector<8x128xf32>, vector<128x24xf32>, vector<8x24xf32> -> vector<8x24xf32>
    %c2_92 = arith.constant 2 : index
    %c0_93 = arith.constant 0 : index
    %c0_94 = arith.constant 0 : index
    %219 = vector.load %arg7[%c2_92, %c0_93, %c0_94] : memref<3x1x24xf32, #tpu.memory_space<vmem>>, vector<1x1x24xf32>
    %220 = vector.shape_cast %219 : vector<1x1x24xf32> to vector<1x24xf32>
    %221 = vector.broadcast %220 : vector<1x24xf32> to vector<8x24xf32>
    %222 = arith.addf %218, %221 : vector<8x24xf32>
    %223 = tpu.iota {dimensions = array<i32: 1>} : vector<8x24xi32>
    %c8_i32_95 = arith.constant 8 : i32
    %c0_i32_96 = arith.constant 0 : i32
    %224 = arith.cmpi eq, %c8_i32_95, %c0_i32_96 : i32
    %c1_i32_97 = arith.constant 1 : i32
    %225 = arith.select %224, %c1_i32_97, %c8_i32_95 : i32
    %226 = vector.broadcast %225 : i32 to vector<8x24xi32>
    %227 = arith.remsi %223, %226 : vector<8x24xi32>
    %c0_i32_98 = arith.constant 0 : i32
    %228 = vector.broadcast %c0_i32_98 : i32 to vector<8x24xi32>
    %229 = arith.cmpi ne, %227, %228 : vector<8x24xi32>
    %c0_i32_99 = arith.constant 0 : i32
    %230 = vector.broadcast %c0_i32_99 : i32 to vector<8x24xi32>
    %231 = arith.cmpi slt, %227, %230 : vector<8x24xi32>
    %c0_i32_100 = arith.constant 0 : i32
    %232 = arith.cmpi slt, %225, %c0_i32_100 : i32
    %233 = vector.broadcast %232 : i1 to vector<8x24xi1>
    %234 = vector.broadcast %233 : vector<8x24xi1> to vector<8x24xi1>
    %235 = arith.xori %231, %234 : vector<8x24xi1>
    %236 = arith.andi %235, %229 : vector<8x24xi1>
    %237 = vector.broadcast %225 : i32 to vector<8x24xi32>
    %238 = arith.addi %227, %237 : vector<8x24xi32>
    %239 = arith.select %236, %238, %227 : vector<8x24xi1>, vector<8x24xi32>
    %c6_i32_101 = arith.constant 6 : i32
    %240 = vector.broadcast %c6_i32_101 : i32 to vector<8x24xi32>
    %241 = arith.cmpi eq, %239, %240 : vector<8x24xi32>
    %c7_i32_102 = arith.constant 7 : i32
    %242 = vector.broadcast %c7_i32_102 : i32 to vector<8x24xi32>
    %243 = arith.cmpi eq, %239, %242 : vector<8x24xi32>
    %244 = tpu.iota {dimensions = array<i32: 0>} : vector<8x24xi32>
    %245 = arith.sitofp %244 : vector<8x24xi32> to vector<8x24xf32>
    %246 = arith.negf %222 : vector<8x24xf32>
    %247 = math.exp %246 : vector<8x24xf32>
    %cst_103 = arith.constant 1.000000e+00 : f32
    %248 = vector.broadcast %cst_103 : f32 to vector<8x24xf32>
    %249 = arith.addf %248, %247 : vector<8x24xf32>
    %250 = arith.divf %248, %249 : vector<8x24xf32>
    %cst_104 = arith.constant 2.000000e+00 : f32
    %251 = vector.broadcast %cst_104 : f32 to vector<8x24xf32>
    %252 = arith.mulf %250, %251 : vector<8x24xf32>
    %cst_105 = arith.constant 5.000000e-01 : f32
    %253 = vector.broadcast %cst_105 : f32 to vector<8x24xf32>
    %254 = arith.subf %252, %253 : vector<8x24xf32>
    %255 = arith.addf %254, %245 : vector<8x24xf32>
    %cst_106 = arith.constant 0.470588237 : f32
    %256 = vector.broadcast %cst_106 : f32 to vector<8x24xf32>
    %257 = arith.mulf %255, %256 : vector<8x24xf32>
    %cst_107 = arith.constant 0.000000e+00 : f32
    %cst_108 = arith.constant 2.000000e+00 : f32
    %258 = vector.broadcast %cst_107 : f32 to vector<8x24xf32>
    %259 = arith.maximumf %258, %257 : vector<8x24xf32>
    %260 = vector.broadcast %cst_108 : f32 to vector<8x24xf32>
    %261 = arith.minimumf %260, %259 : vector<8x24xf32>
    %262 = arith.mulf %252, %252 : vector<8x24xf32>
    %c2_109 = arith.constant 2 : index
    %c0_110 = arith.constant 0 : index
    %c0_111 = arith.constant 0 : index
    %263 = vector.load %arg8[%c2_109, %c0_110, %c0_111] : memref<3x1x24xf32, #tpu.memory_space<vmem>>, vector<1x1x24xf32>
    %264 = vector.shape_cast %263 : vector<1x1x24xf32> to vector<1x24xf32>
    %265 = vector.broadcast %264 : vector<1x24xf32> to vector<8x24xf32>
    %266 = arith.mulf %262, %265 : vector<8x24xf32>
    %cst_112 = arith.constant 0.000000e+00 : f32
    %cst_113 = arith.constant 2.000000e+00 : f32
    %267 = vector.broadcast %cst_112 : f32 to vector<8x24xf32>
    %268 = arith.maximumf %267, %266 : vector<8x24xf32>
    %269 = vector.broadcast %cst_113 : f32 to vector<8x24xf32>
    %270 = arith.minimumf %269, %268 : vector<8x24xf32>
    %271 = arith.select %243, %270, %222 : vector<8x24xi1>, vector<8x24xf32>
    %272 = arith.select %241, %261, %271 : vector<8x24xi1>, vector<8x24xf32>
    %273 = vector.extract_strided_slice %272 {offsets = [0, 0], sizes = [4, 24], strides = [1, 1]} : vector<8x24xf32> to vector<4x24xf32>
    %c0_114 = arith.constant 0 : index
    %c0_115 = arith.constant 0 : index
    %c0_116 = arith.constant 0 : index
    %274 = vector.load %arg11[%c0_114, %c0_115, %c0_116] : memref<1x4x24xf32, #tpu.memory_space<vmem>>, vector<1x4x24xf32>
    %275 = vector.shape_cast %274 : vector<1x4x24xf32> to vector<4x24xf32>
    %276 = vector.shape_cast %273 : vector<4x24xf32> to vector<1x4x24xf32>
    tpu.vector_store %arg11[%c0_114, %c0_115, %c0_116], %276 {strides = array<i32>} : memref<1x4x24xf32, #tpu.memory_space<vmem>>, vector<1x4x24xf32>,
    return
  }
  func.func @transform_0(%arg0: i32) -> (i32, i32, i32) {
    %c0_i32 = arith.constant 0 : i32
    %c0_i32_0 = arith.constant 0 : i32
    %c0_i32_1 = arith.constant 0 : i32
    return %arg0, %c0_i32, %c0_i32_0 : i32, i32, i32
  }
  func.func @transform_1(%arg0: i32) -> (i32, i32) {
    %c0_i32 = arith.constant 0 : i32
    %c0_i32_0 = arith.constant 0 : i32
    %c0_i32_1 = arith.constant 0 : i32
    return %c0_i32, %c0_i32_0 : i32, i32
  }
  func.func @transform_2(%arg0: i32) -> (i32, i32) {
    %c0_i32 = arith.constant 0 : i32
    %c0_i32_0 = arith.constant 0 : i32
    %c0_i32_1 = arith.constant 0 : i32
    return %c0_i32, %c0_i32_0 : i32, i32
  }
  func.func @transform_3(%arg0: i32) -> (i32, i32) {
    %c0_i32 = arith.constant 0 : i32
    %c0_i32_0 = arith.constant 0 : i32
    %c0_i32_1 = arith.constant 0 : i32
    return %c0_i32, %c0_i32_0 : i32, i32
  }
  func.func @transform_4(%arg0: i32) -> (i32, i32) {
    %c0_i32 = arith.constant 0 : i32
    %c0_i32_0 = arith.constant 0 : i32
    %c0_i32_1 = arith.constant 0 : i32
    return %c0_i32, %c0_i32_0 : i32, i32
  }
  func.func @transform_5(%arg0: i32) -> (i32, i32, i32) {
    %c0_i32 = arith.constant 0 : i32
    %c0_i32_0 = arith.constant 0 : i32
    %c0_i32_1 = arith.constant 0 : i32
    %c0_i32_2 = arith.constant 0 : i32
    return %c0_i32, %c0_i32_0, %c0_i32_1 : i32, i32, i32
  }
  func.func @transform_6(%arg0: i32) -> (i32, i32, i32) {
    %c0_i32 = arith.constant 0 : i32
    %c0_i32_0 = arith.constant 0 : i32
    %c0_i32_1 = arith.constant 0 : i32
    %c0_i32_2 = arith.constant 0 : i32
    return %c0_i32, %c0_i32_0, %c0_i32_1 : i32, i32, i32
  }
  func.func @transform_7(%arg0: i32) -> (i32, i32, i32) {
    %c0_i32 = arith.constant 0 : i32
    %c0_i32_0 = arith.constant 0 : i32
    %c0_i32_1 = arith.constant 0 : i32
    %c0_i32_2 = arith.constant 0 : i32
    return %c0_i32, %c0_i32_0, %c0_i32_1 : i32, i32, i32
  }
  func.func @transform_8(%arg0: i32) -> (i32, i32, i32) {
    %c0_i32 = arith.constant 0 : i32
    %c0_i32_0 = arith.constant 0 : i32
    %c0_i32_1 = arith.constant 0 : i32
    return %arg0, %c0_i32, %c0_i32_0 : i32, i32, i32
  }
  func.func @transform_9(%arg0: i32) -> (i32, i32, i32) {
    %c0_i32 = arith.constant 0 : i32
    %c0_i32_0 = arith.constant 0 : i32
    %c0_i32_1 = arith.constant 0 : i32
    return %arg0, %c0_i32, %c0_i32_0 : i32, i32, i32
  }
  func.func @transform_10(%arg0: i32) -> (i32, i32, i32) {
    %c0_i32 = arith.constant 0 : i32
    %c0_i32_0 = arith.constant 0 : i32
    %c0_i32_1 = arith.constant 0 : i32
    return %arg0, %c0_i32, %c0_i32_0 : i32, i32, i32
  }
}

</mosaic_0001>

<bundles_post_ra>
// kernel: audio_detection_forward.1
= control target key start
LH: loop header
LB: loop body
LE: loop exit
PB: predicated region body
PF: predicated region fallthrough
CT: control target
= control target key end

     0   :  { %s2555_s13 = smov 0   ;;  %s3172_s0 = inlined_call_operand.vmem [shape: f32[2,56,64], index: 0, kind: input, shape index: {}]   ;;  %s3173_s1 = inlined_call_operand.vmem [shape: f32[64,128], index: 1, kind: input, shape index: {}]   ;;  %s3174_s2 = inlined_call_operand.vmem [shape: f32[64,64], index: 2, kind: input, shape index: {}]   ;;  %s3175_s3 = inlined_call_operand.vmem [shape: f32[64,64], index: 3, kind: input, shape index: {}]   ;;  %s3176_s4 = inlined_call_operand.vmem [shape: f32[32,56], index: 4, kind: input, shape index: {}]   ;;  %s3177_s5 = inlined_call_operand.vmem [shape: f32[3,128,24], index: 5, kind: input, shape index: {}]   ;;  %s3178_s6 = inlined_call_operand.vmem [shape: f32[3,1,24], index: 6, kind: input, shape index: {}]   ;;  %s3179_s7 = inlined_call_operand.vmem [shape: f32[3,1,24], index: 7, kind: input, shape index: {}]   ;;  %s3180_s8 = inlined_call_operand.vmem [shape: f32[2,16,24], index: 8, kind: output, shape index: {0}]   ;;  %s3181_s9 = inlined_call_operand.vmem [shape: f32[2,8,24], index: 9, kind: output, shape index: {1}]   ;;  %s3182_s10 = inlined_call_operand.vmem [shape: f32[2,4,24], index: 10, kind: output, shape index: {2}]  }
   0x1 LB: > { %s1822_s14 = sadd.s32 4294967295, %s2494_s13   ;;  %p1826_p0 = scmp.ge.s32.totalorder %s2494_s13, 1  ;;  %s2494_s13 = sphi %s2555_s13, %s21_s13  }
   0x2   : > { %p317_p1 = scmp.lt.s32.totalorder %s2494_s13, 3 }
   0x4   : > { %p318_p2 = pnand %p1826_p0, %p317_p1 }
   0x5   : > { %v388_v0 = vld [vmem:[%s3173_s1] sm:$0xff] (!%p318_p2)  ;;  %v389_v1 = vld [vmem:[%s3173_s1 + $0x8] sm:$0xff] (!%p318_p2)  ;;  %v390_v2 = vld [vmem:[%s3173_s1 + $0x10] sm:$0xff] (!%p318_p2)  ;;  %v2496_v3 = vmov (!%p318_p2), 0.0|0.0   ;;  %p363_p3 = scmp.lt.s32.totalorder (!%p318_p2), %s1822_s14, 1  ;;  %vm2497_vm0 = vmmov (!%p318_p2), 0  }
   0x6   : > { %321 = sbr.rel (%p318_p2) target bundleno = 2500 (0x9c4), region = 52  ;;  %2256 = vmatprep.subr.bf16.mxu0 (!%p318_p2), %v2496_v3  ;;  %v2257_v4 = vpack.c.bf16 (!%p318_p2), %v389_v1, %v388_v0  ;;  %2384 = vmatprep.subr.bf16.mxu1 (!%p318_p2), %v2496_v3  ;;  %v391_v5 = vld [vmem:[%s3173_s1 + $0x18] sm:$0xff] (!%p318_p2)  ;;  %v2498_v6 = vmov (!%p318_p2), 0.0   ;;  %v392_v8 = vld [vmem:[%s3173_s1 + $0x20] sm:$0xff] (!%p318_p2)  ;;  %v393_v9 = vld [vmem:[%s3173_s1 + $0x28] sm:$0xff] (!%p318_p2)  ;;  %vm396_vm1 = vcmask (!%p318_p2), 523264  }
   0x7   : > { %2036 = vmatprep.mubr.msk.f32.mxu0 (!%p318_p2), %vm2497_vm0, %v2498_v6  ;;  %2048 = vmatprep.mubr.msk.f32.mxu1 (!%p318_p2), %vm2497_vm0, %v2498_v6  ;;  %v2260_v7 = vpack.c.bf16 (!%p318_p2), %v391_v5, %v390_v2  ;;  %v2263_v10 = vpack.c.bf16 (!%p318_p2), %v393_v9, %v392_v8  ;;  %v394_v11 = vld [vmem:[%s3173_s1 + $0x30] sm:$0xff] (!%p318_p2)  ;;  %v395_v12 = vld [vmem:[%s3173_s1 + $0x38] sm:$0xff] (!%p318_p2)  ;;  %v560_v21 = vld [vmem:[%s3174_s2] sm:$0xff] (!%p318_p2)  ;;  %s2499_s15 = smov (!%p318_p2), 64   ;;  %vm1200_vm7 = vcmask (!%p318_p2), 457728   ;;  %vm1457_vm10 = vcmask (!%p318_p2), 195584  }
   0x8   : > { %2258 = vmatpush3.bf16.msra.mxu0 (!%p318_p2), %v2257_v4  ;;  %2388 = vmatpush3.bf16.msra.mxu1 (!%p318_p2), %v2257_v4  ;;  %v2266_v13 = vpack.c.bf16 (!%p318_p2), %v395_v12, %v394_v11  ;;  %v561_v22 = vld [vmem:[%s3174_s2 + $0x8] sm:$0xff] (!%p318_p2)  ;;  %v562_v23 = vld [vmem:[%s3174_s2 + $0x10] sm:$0xff] (!%p318_p2)  ;;  %v563_v25 = vld [vmem:[%s3174_s2 + $0x18] sm:$0xff] (!%p318_p2)  ;;  %vm1703_vm11 = vcmask (!%p318_p2), 191488  }
   0x9   : > { %2259 = vmatprep.subr.bf16.mxu0 (!%p318_p2), %v2496_v3  ;;  %2385 = vmatprep.subr.bf16.mxu1 (!%p318_p2), %v2496_v3  ;;  %v2269_v24 = vpack.c.bf16 (!%p318_p2), %v561_v22, %v560_v21  ;;  %v2272_v26 = vpack.c.bf16 (!%p318_p2), %v563_v25, %v562_v23  ;;  %v564_v27 = vld [vmem:[%s3174_s2 + $0x20] sm:$0xff] (!%p318_p2)  ;;  %v565_v28 = vld [vmem:[%s3174_s2 + $0x28] sm:$0xff] (!%p318_p2)  ;;  %v566_v30 = vld [vmem:[%s3174_s2 + $0x30] sm:$0xff] (!%p318_p2) }
   0xa   : > { %v2275_v29 = vpack.c.bf16 (!%p318_p2), %v565_v28, %v564_v27  ;;  %v567_v31 = vld [vmem:[%s3174_s2 + $0x38] sm:$0xff] (!%p318_p2)  ;;  %v868_v5 = vld [vmem:[%s3175_s3] sm:$0xff] (!%p318_p2)  ;;  %v870_v9 = vld [vmem:[%s3175_s3 + $0x10] sm:$0xff] (!%p318_p2) }
   0xb   : > { %v2278_v32 = vpack.c.bf16 (!%p318_p2), %v567_v31, %v566_v30  ;;  %v872_v12 = vld [vmem:[%s3175_s3 + $0x20] sm:$0xff] (!%p318_p2) }
   0xc   : > { %2261 = vmatpush3.bf16.msra.mxu0 (!%p318_p2), %v2260_v7  ;;  %2389 = vmatpush3.bf16.msra.mxu1 (!%p318_p2), %v2260_v7  ;;  %v869_v7 = vld [vmem:[%s3175_s3 + $0x8] sm:$0xff] (!%p318_p2) }
   0xd   : > { %s3188_s14 = smov (!%p363_p3, %s1822_s14), 1  ;;  %2262 = vmatprep.subr.bf16.mxu0 %v2496_v3  ;;  %2386 = vmatprep.subr.bf16.mxu1 %v2496_v3  ;;  %v2281_v8 = vpack.c.bf16 %v869_v7, %v868_v5 }
   0xe   : > { %s2392_s11 = smul.u32 56, %s3188_s14 }
  0x10   : > { %2264 = vmatpush3.bf16.msra.mxu0 %v2263_v10  ;;  %2390 = vmatpush3.bf16.msra.mxu1 %v2263_v10  ;;  %s367_s16 = scalar_lea.vmem %s3172_s0, %s2392_s11  ;;  %v871_v10 = vld [vmem:[%s3175_s3 + $0x18] sm:$0xff] }
  0x11   : > { %2265 = vmatprep.subr.bf16.mxu0 %v2496_v3  ;;  %2387 = vmatprep.subr.bf16.mxu1 %v2496_v3  ;;  %v381_v14 = vld [vmem:[%s367_s16] sm:$0xff]  ;;  %v382_v16 = vld [vmem:[%s367_s16 + $0x8] sm:$0xff]  ;;  %v383_v18 = vld [vmem:[%s367_s16 + $0x10] sm:$0xff]  ;;  %v2284_v11 = vpack.c.bf16 %v871_v10, %v870_v9 }
  0x12   : > { %v385_v15 = vld [vmem:[%s367_s16 + $0x20] sm:$0xff]  ;;  %v386_v17 = vld [vmem:[%s367_s16 + $0x28] sm:$0xff]  ;;  %v387_v19 = vld [vmem:[%s367_s16 + $0x30] sm:$0xff] }
  0x13   : > { %v384_v20 = vld [vmem:[%s367_s16 + $0x18] sm:$0xff] }
  0x14   : > { %2267 = vmatpush3.bf16.msra.mxu0 %v2266_v13  ;;  %2391 = vmatpush3.bf16.msra.mxu1 %v2266_v13  ;;  %v873_v13 = vld [vmem:[%s3175_s3 + $0x28] sm:$0xff] }
  0x15   : > { %2268 = vmatprep.subr.bf16.mxu1 %v2496_v3  ;;  %2280 = vmatprep.subr.bf16.mxu0 %v2496_v3 }
  0x17   : > { %2037 = vmatmul.mubr.msk.f32.vlgmr.msra.gmra.mrb[0].mxu0 %vm396_vm1, %v381_v14  ;;  %2049 = vmatmul.mubr.msk.f32.vlgmr.msra.gmra.mrb[0].mxu1 %vm396_vm1, %v385_v15  ;;  %v2287_v14 = vpack.c.bf16 %v873_v13, %v872_v12  ;;  %v874_v15 = vld [vmem:[%s3175_s3 + $0x30] sm:$0xff] }
  0x18   : > { %2039 = vmatprep.mubr.msk.f32.mxu0 %vm2497_vm0, %v2498_v6  ;;  %2051 = vmatprep.mubr.msk.f32.mxu1 %vm2497_vm0, %v2498_v6 }
  0x19   : > { %2270 = vmatpush3.bf16.msra.mxu1 %v2269_v24  ;;  %2282 = vmatpush3.bf16.msra.mxu0 %v2281_v8 }
  0x1a   : > { %2271 = vmatprep.subr.bf16.mxu1 %v2496_v3  ;;  %2283 = vmatprep.subr.bf16.mxu0 %v2496_v3 }
  0x1b   : > { %2040 = vmatmul.mubr.msk.f32.gmra.mrb[2].mxu0 %vm396_vm1, %v382_v16  ;;  %2052 = vmatmul.mubr.msk.f32.gmra.mrb[2].mxu1 %vm396_vm1, %v386_v17  ;;  %v875_v16 = vld [vmem:[%s3175_s3 + $0x38] sm:$0xff] }
  0x1c   : > { %2042 = vmatprep.mubr.msk.f32.mxu0 %vm2497_vm0, %v2498_v6  ;;  %2054 = vmatprep.mubr.msk.f32.mxu1 %vm2497_vm0, %v2498_v6  ;;  %v2290_v17 = vpack.c.bf16 %v875_v16, %v874_v15 }
  0x1d   : > { %2273 = vmatpush3.bf16.msra.mxu1 %v2272_v26  ;;  %2285 = vmatpush3.bf16.msra.mxu0 %v2284_v11 }
  0x1e   : > { %2274 = vmatprep.subr.bf16.mxu1 %v2496_v3  ;;  %2286 = vmatprep.subr.bf16.mxu0 %v2496_v3 }
  0x1f   : > { %2043 = vmatmul.mubr.msk.f32.gmra.mrb[4].mxu0 %vm396_vm1, %v383_v18  ;;  %2055 = vmatmul.mubr.msk.f32.gmra.mrb[4].mxu1 %vm396_vm1, %v387_v19 }
  0x20   : > { %2045 = vmatprep.mubr.msk.f32.mxu0 %vm2497_vm0, %v2498_v6  ;;  %2073 = vmatprep.mubr.msk.f32.mxu1 %vm2497_vm0, %v2498_v6 }
  0x21   : > { %2276 = vmatpush3.bf16.msra.mxu1 %v2275_v29  ;;  %2288 = vmatpush3.bf16.msra.mxu0 %v2287_v14 }
  0x22   : > { %2277 = vmatprep.subr.bf16.mxu1 %v2496_v3  ;;  %2289 = vmatprep.subr.bf16.mxu0 %v2496_v3 }
  0x23   : > { %2046 = vmatmul.mubr.msk.f32.gmra.mrb[6].mxu0 %vm396_vm1, %v384_v20 }
  0x24   : > { %2110 = vmatprep.mubr.msk.f32.mxu0 %vm2497_vm0, %v2498_v6 }
  0x25   : > { %2279 = vmatpush3.bf16.msra.mxu1 %v2278_v32  ;;  %2291 = vmatpush3.bf16.msra.mxu0 %v2290_v17 }
  0xea   : > { %v484_v33 = vpop.f32.mrb[0].mxu0  ;;  %v504_v34 = vpop.f32.mrb[0].mxu1 }
  0xeb   : > { %v518_v35 = vmul.f32 %v484_v33, %v484_v33  ;;  %v2038_v36 = vpop.f32.mrb[1].mxu0  ;;  %v2050_v37 = vpop.f32.mrb[1].mxu1  ;;  %v522_v43 = vmul.f32 %v504_v34, %v504_v34 }
  0xed   : > { %532 = vrot.lane.b32.xlu0 %v518_v35, %s2499_s15 }
  0xee   : > { %v489_v38 = vpop.f32.mrb[2].mxu0  ;;  %v509_v39 = vpop.f32.mrb[2].mxu1 }
  0xef   : > { %v519_v40 = vmul.f32 %v489_v38, %v489_v38  ;;  %v2041_v41 = vpop.f32.mrb[3].mxu0  ;;  %v2053_v42 = vpop.f32.mrb[3].mxu1  ;;  %v523_v53 = vmul.f32 %v509_v39, %v509_v39 }
  0xf1   : > { %534 = vrot.lane.b32.xlu0 %v519_v40, %s2499_s15 }
  0xf2   : > { %v494_v44 = vpop.f32.mrb[4].mxu0  ;;  %v514_v45 = vpop.f32.mrb[4].mxu1 }
  0xf3   : > { %v520_v46 = vmul.f32 %v494_v44, %v494_v44  ;;  %v2044_v47 = vpop.f32.mrb[5].mxu0  ;;  %v2056_v48 = vpop.f32.mrb[5].mxu1  ;;  %v524_v49 = vmul.f32 %v514_v45, %v514_v45 }
  0xf5   : > { %540 = vrot.lane.b32.xlu0 %v522_v43, %s2499_s15  ;;  %536 = vrot.lane.b32.xlu1 %v520_v46, %s2499_s15 }
  0xf6   : > { %v499_v50 = vpop.f32.mrb[6].mxu0 }
  0xf7   : > { %v521_v51 = vmul.f32 %v499_v50, %v499_v50  ;;  %v2047_v52 = vpop.f32.mrb[7].mxu0  ;;  %v689_v50 = vlaneseq }
  0xf9   : > { %544 = vrot.lane.b32.xlu0 %v524_v49, %s2499_s15  ;;  %538 = vrot.lane.b32.xlu1 %v521_v51, %s2499_s15 }
  0xfd   : > { %542 = vrot.lane.b32.xlu1 %v523_v53, %s2499_s15 }
 0x15f   : > { %v533_v54 = vpop.permute.xlu0 %532 }
 0x160   : > { %v553_v55 = vadd.f32 %v533_v54, %v518_v35  ;;  %v2733_v54 = vshrl.u32 %v689_v50, 7 }
 0x162   : > { %2074 = vmatmul.mubr.msk.f32.vlgmr.msra.gmra.mrb[6].mxu1 %vm396_vm1, %v553_v55 }
 0x163   : > { %v535_v56 = vpop.permute.xlu0 %534  ;;  %2076 = vmatprep.mubr.msk.f32.mxu1 %vm2497_vm0, %v2498_v6 }
 0x164   : > { %v554_v57 = vadd.f32 %v535_v56, %v519_v40 }
 0x166   : > { %2077 = vmatmul.mubr.msk.f32.gmra.mrb[8].mxu1 %vm396_vm1, %v554_v57 }
 0x167   : > { %v537_v58 = vpop.permute.xlu1 %536  ;;  %2079 = vmatprep.mubr.msk.f32.mxu1 %vm2497_vm0, %v2498_v6  ;;  %v541_v62 = vpop.permute.xlu0 %540 }
 0x168   : > { %v555_v59 = vadd.f32 %v537_v58, %v520_v46  ;;  %v557_v63 = vadd.f32 %v541_v62, %v522_v43  ;;  %v2742_v58 = vadd.s32 48, %v2733_v54 }
 0x16a   : > { %2080 = vmatmul.mubr.msk.f32.gmra.mrb[10].mxu1 %vm396_vm1, %v555_v59  ;;  %vm703_vm2 = vcmp.lt.s32.totalorder %v2742_v58, 51 }
 0x16b   : > { %v539_v60 = vpop.permute.xlu1 %538  ;;  %2082 = vmatprep.mubr.msk.f32.mxu1 %vm2497_vm0, %v2498_v6  ;;  %v545_v2 = vpop.permute.xlu0 %544 }
 0x16c   : > { %v556_v61 = vadd.f32 %v539_v60, %v521_v51  ;;  %v559_v4 = vadd.f32 %v545_v2, %v524_v49 }
 0x16e   : > { %2083 = vmatmul.mubr.msk.f32.gmra.mrb[12].mxu1 %vm396_vm1, %v556_v61 }
 0x16f   : > { %2085 = vmatprep.mubr.msk.f32.mxu1 %vm2497_vm0, %v2498_v6  ;;  %v543_v0 = vpop.permute.xlu1 %542 }
 0x170   : > { %v558_v1 = vadd.f32 %v543_v0, %v523_v53 }
 0x172   : > { %2086 = vmatmul.mubr.msk.f32.gmra.mrb[14].mxu1 %vm396_vm1, %v557_v63 }
 0x173   : > { %2088 = vmatprep.mubr.msk.f32.mxu1 %vm2497_vm0, %v2498_v6 }
 0x176   : > { %2089 = vmatmul.mubr.msk.f32.gmra.mrb[16].mxu1 %vm396_vm1, %v558_v1 }
 0x177   : > { %2091 = vmatprep.mubr.msk.f32.mxu1 %vm2497_vm0, %v2498_v6 }
 0x17a   : > { %2092 = vmatmul.mubr.msk.f32.gmra.mrb[18].mxu1 %vm396_vm1, %v559_v4 }
 0x235   : > { %v655_v18 = vpop.f32.mrb[6].mxu1 }
 0x236   : > { %v704_v19 = vmax.f32 %v655_v18, 1e-10  ;;  %v2075_v20 = vpop.f32.mrb[7].mxu1 }
 0x238   : > { %2436 = vlog2.f32 %v704_v19 }
 0x239   : > { %v660_v21 = vpop.f32.mrb[8].mxu1 }
 0x23a   : > { %v705_v22 = vmax.f32 %v660_v21, 1e-10  ;;  %v2078_v23 = vpop.f32.mrb[9].mxu1 }
 0x23c   : > { %2438 = vlog2.f32 %v705_v22 }
 0x23d   : > { %v665_v24 = vpop.f32.mrb[10].mxu1 }
 0x23e   : > { %v706_v25 = vmax.f32 %v665_v24, 1e-10  ;;  %v2081_v26 = vpop.f32.mrb[11].mxu1 }
 0x240   : > { %2440 = vlog2.f32 %v706_v25 }
 0x241   : > { %v670_v27 = vpop.f32.mrb[12].mxu1 }
 0x242   : > { %v2437_v28 = vpop.eup %2436  ;;  %v707_v29 = vmax.f32 %v670_v27, 1e-10  ;;  %v2084_v30 = vpop.f32.mrb[13].mxu1 }
 0x243   : > { %v712_v31 = vmul.f32 0.6931472, %v2437_v28 }
 0x244   : > { %2442 = vlog2.f32 %v707_v29 }
 0x245   : > { %v2708_v32 = vmul.f32 4.3429446, %v712_v31  ;;  %v675_v33 = vpop.f32.mrb[14].mxu1 }
 0x246   : > { %v2439_v34 = vpop.eup %2438  ;;  %v708_v35 = vmax.f32 %v675_v33, 1e-10  ;;  %v2087_v36 = vpop.f32.mrb[15].mxu1 }
 0x247   : > { %v714_v37 = vmul.f32 0.6931472, %v2439_v34  ;;  %2111 = vmatmul.mubr.msk.f32.vlgmr.msra.gmra.mrb[8].mxu0 %vm396_vm1, %v2708_v32  ;;  %v739_v5 = vsel %vm396_vm1, %v2708_v32, -inf }
 0x248   : > { %2444 = vlog2.f32 %v708_v35  ;;  %2113 = vmatprep.mubr.msk.f32.mxu0 %vm2497_vm0, %v2498_v6 }
 0x249   : > { %v2714_v38 = vmul.f32 4.3429446, %v714_v37  ;;  %v680_v39 = vpop.f32.mrb[16].mxu1 }
 0x24a   : > { %v2441_v40 = vpop.eup %2440  ;;  %v709_v41 = vmax.f32 %v680_v39, 1e-10  ;;  %v2090_v42 = vpop.f32.mrb[17].mxu1 }
 0x24b   : > { %v716_v43 = vmul.f32 0.6931472, %v2441_v40  ;;  %2114 = vmatmul.mubr.msk.f32.gmra.mrb[10].mxu0 %vm396_vm1, %v2714_v38  ;;  %v740_v0 = vsel %vm396_vm1, %v2714_v38, -inf }
 0x24c   : > { %2446 = vlog2.f32 %v709_v41  ;;  %2116 = vmatprep.mubr.msk.f32.mxu0 %vm2497_vm0, %v2498_v6 }
 0x24d   : > { %v2720_v44 = vmul.f32 4.3429446, %v716_v43  ;;  %v685_v45 = vpop.f32.mrb[18].mxu1 }
 0x24e   : > { %v2443_v46 = vpop.eup %2442  ;;  %v710_v47 = vmax.f32 %v685_v45, 1e-10  ;;  %v2093_v48 = vpop.f32.mrb[19].mxu1 }
 0x24f   : > { %v718_v49 = vmul.f32 0.6931472, %v2443_v46  ;;  %2117 = vmatmul.mubr.msk.f32.gmra.mrb[12].mxu0 %vm396_vm1, %v2720_v44  ;;  %v741_v7 = vsel %vm396_vm1, %v2720_v44, -inf }
 0x250   : > { %2448 = vlog2.f32 %v710_v47  ;;  %2119 = vmatprep.mubr.msk.f32.mxu0 %vm2497_vm0, %v2498_v6 }
 0x251   : > { %v2726_v51 = vmul.f32 4.3429446, %v718_v49 }
 0x252   : > { %v2445_v52 = vpop.eup %2444 }
 0x253   : > { %v720_v53 = vmul.f32 0.6931472, %v2445_v52  ;;  %2120 = vmatmul.mubr.msk.f32.gmra.mrb[14].mxu0 %vm396_vm1, %v2726_v51  ;;  %v742_v11 = vsel %vm396_vm1, %v2726_v51, -inf }
 0x254   : > { %2122 = vmatprep.mubr.msk.f32.mxu0 %vm2497_vm0, %v2498_v6 }
 0x255   : > { %v2735_v55 = vmul.f32 4.3429446, %v720_v53 }
 0x256   : > { %v2447_v56 = vpop.eup %2446 }
 0x257   : > { %v722_v57 = vmul.f32 0.6931472, %v2447_v56  ;;  %2123 = vmatmul.mubr.msk.f32.gmra.mrb[16].mxu0 %vm396_vm1, %v2735_v55  ;;  %v743_v1 = vsel %vm396_vm1, %v2735_v55, -inf }
 0x258   : > { %2125 = vmatprep.mubr.msk.f32.mxu0 %vm2497_vm0, %v2498_v6  ;;  %v744_v9 = vmax.f32 %v739_v5, %v743_v1 }
 0x259   : > { %v2744_v59 = vmul.f32 4.3429446, %v722_v57 }
 0x25a   : > { %v2449_v60 = vpop.eup %2448 }
 0x25b   : > { %v724_v61 = vmul.f32 0.6931472, %v2449_v60  ;;  %2126 = vmatmul.mubr.msk.f32.gmra.mrb[18].mxu0 %vm396_vm1, %v2744_v59  ;;  %v745_v62 = vsel %vm396_vm1, %v2744_v59, -inf }
 0x25c   : > { %2128 = vmatprep.mubr.msk.f32.mxu0 %vm2497_vm0, %v2498_v6  ;;  %v746_v4 = vmax.f32 %v740_v0, %v745_v62 }
 0x25d   : > { %v2753_v63 = vmul.f32 4.3429446, %v724_v61 }
 0x25e   : > { %v749_v12 = vmax.f32 %v744_v9, %v746_v4 }
 0x25f   : > { %2129 = vmatmul.mubr.msk.f32.gmra.mrb[20].mxu0 %vm396_vm1, %v2753_v63  ;;  %v738_v2 = vsel %vm703_vm2, %v2753_v63, -1e+30 }
 0x260   : > { %v747_v8 = vsel %vm396_vm1, %v738_v2, -inf }
 0x261   : > { %v748_v10 = vmax.f32 %v741_v7, %v747_v8 }
 0x263   : > { %v750_v13 = vmax.f32 %v748_v10, %v742_v11 }
 0x265   : > { %v751_v14 = vmax.f32 %v749_v12, %v750_v13 }
 0x267   : > { %752 = vmax.xlane.f32.xlu1 %v751_v14 }
 0x2f4   : > { %v753_v15 = vpop.xlane.xlu1 %752 }
 0x2f5   : > { %v754_v16 = vrot.slane %v753_v15, 4 }
 0x2f7   : > { %v755_v17 = vmax.f32 %v753_v15, %v754_v16 }
 0x2f9   : > { %v756_v18 = vrot.slane %v755_v17, 2 }
 0x2fb   : > { %v757_v19 = vmax.f32 %v755_v17, %v756_v18 }
 0x2fd   : > { %v758_v20 = vrot.slane %v757_v19, 1 }
 0x2ff   : > { %v759_v21 = vmax.f32 %v757_v19, %v758_v20 }
 0x301   : > { %2393 = vpush %v759_v21 }
 0x31a   : > { %v963_v22 = vpop.f32.mrb[8].mxu0 }
 0x31b   : > { %v2112_v23 = vpop.f32.mrb[9].mxu0  ;;  %v997_v33 = vmax.f32 %v963_v22, 1e-10 }
 0x31e   : > { %v968_v24 = vpop.f32.mrb[10].mxu0 }
 0x31f   : > { %v2115_v25 = vpop.f32.mrb[11].mxu0  ;;  %v998_v30 = vmax.f32 %v968_v24, 1e-10 }
 0x321   : > { %2450 = vlog2.f32 %v998_v30 }
 0x322   : > { %v973_v26 = vpop.f32.mrb[12].mxu0 }
 0x323   : > { %v2118_v27 = vpop.f32.mrb[13].mxu0  ;;  %v999_v36 = vmax.f32 %v973_v26, 1e-10 }
 0x326   : > { %v978_v28 = vpop.f32.mrb[14].mxu0 }
 0x327   : > { %v2121_v29 = vpop.f32.mrb[15].mxu0  ;;  %v1000_v37 = vmax.f32 %v978_v28, 1e-10 }
 0x32a   : > { %v983_v31 = vpop.f32.mrb[16].mxu0 }
 0x32b   : > { %v1001_v34 = vmax.f32 %v983_v31, 1e-10  ;;  %v2124_v35 = vpop.f32.mrb[17].mxu0  ;;  %v2451_v52 = vpop.eup %2450 }
 0x32c   : > { %v1007_v0 = vmul.f32 0.6931472, %v2451_v52 }
 0x32d   : > { %2452 = vlog2.f32 %v1001_v34 }
 0x32e   : > { %v988_v39 = vpop.f32.mrb[18].mxu0  ;;  %2454 = vlog2.f32 %v997_v33  ;;  %v2794_v13 = vmul.f32 4.3429446, %v1007_v0 }
 0x32f   : > { %v1002_v40 = vmax.f32 %v988_v39, 1e-10  ;;  %v2127_v41 = vpop.f32.mrb[19].mxu0  ;;  %2456 = vlog2.f32 %v999_v36 }
 0x330   : > { %v1033_v26 = vsel %vm396_vm1, %v2794_v13, -inf }
 0x331   : > { %2458 = vlog2.f32 %v1002_v40 }
 0x332   : > { %2460 = vlog2.f32 %v1000_v37  ;;  %s2394_s12 = spop %2393  ;;  %v993_v42 = vpop.f32.mrb[20].mxu0 }
 0x333   : > { %s1846_s16 = sadd.f32 -80.0, %s2394_s12  ;;  %v1003_v43 = vmax.f32 %v993_v42, 1e-10  ;;  %v2130_v45 = vpop.f32.mrb[21].mxu0 }
 0x335   : > { %v762_v46 = vstv %s1846_s16  ;;  %2462 = vlog2.f32 %v1003_v43 }
 0x336   : > { %v2772_v47 = vmax.f32 %v2708_v32, %v762_v46  ;;  %v2775_v48 = vmax.f32 %v2714_v38, %v762_v46  ;;  %v2778_v49 = vmax.f32 %v2720_v44, %v762_v46  ;;  %v2781_v56 = vmax.f32 %v2726_v51, %v762_v46 }
 0x337   : > { %v2453_v53 = vpop.eup %2452  ;;  %v767_v38 = vmax.f32 %v2735_v55, %v762_v46  ;;  %v769_v51 = vmax.f32 %v2753_v63, %v762_v46  ;;  %v768_v8 = vmax.f32 %v2744_v59, %v762_v46 }
 0x338   : > { %v777_v57 = vsel %vm396_vm1, %v2772_v47, 0.0  ;;  %v778_v60 = vsel %vm396_vm1, %v2775_v48, 0.0  ;;  %v2455_v61 = vpop.eup %2454  ;;  %v780_v44 = vsel %vm396_vm1, %v2778_v49, 0.0  ;;  %v1013_v2 = vmul.f32 0.6931472, %v2453_v53 }
 0x339   : > { %v779_v32 = vadd.f32 %v778_v60, %v777_v57  ;;  %v2457_v62 = vpop.eup %2456  ;;  %v782_v9 = vsel %vm396_vm1, %v2781_v56, 0.0  ;;  %v1005_v10 = vmul.f32 0.6931472, %v2455_v61  ;;  %v784_v14 = vsel %vm396_vm1, %v767_v38, 0.0 }
 0x33a   : > { %v1009_v11 = vmul.f32 0.6931472, %v2457_v62  ;;  %v2799_v63 = vmul.f32 4.3429446, %v1013_v2  ;;  %v776_v17 = vsel %vm703_vm2, %v769_v51, 0.0  ;;  %v786_v19 = vsel %vm396_vm1, %v768_v8, 0.0 }
 0x33b   : > { %v2459_v1 = vpop.eup %2458  ;;  %v781_v4 = vadd.f32 %v780_v44, %v779_v32  ;;  %v2804_v20 = vmul.f32 4.3429446, %v1005_v10  ;;  %v788_v25 = vsel %vm396_vm1, %v776_v17, 0.0 }
 0x33c   : > { %v2461_v5 = vpop.eup %2460  ;;  %v1015_v7 = vmul.f32 0.6931472, %v2459_v1  ;;  %v2806_v21 = vmul.f32 4.3429446, %v1009_v11  ;;  %v1036_v28 = vsel %vm396_vm1, %v2799_v63, -inf }
 0x33d   : > { %v783_v12 = vadd.f32 %v782_v9, %v781_v4  ;;  %v1011_v16 = vmul.f32 0.6931472, %v2461_v5  ;;  %v1032_v33 = vsel %vm396_vm1, %v2804_v20, -inf }
 0x33e   : > { %v2796_v55 = vmul.f32 4.3429446, %v1015_v7  ;;  %v1034_v34 = vsel %vm396_vm1, %v2806_v21, -inf  ;;  %v1037_v36 = vmax.f32 %v1032_v33, %v1036_v28 }
 0x33f   : > { %v2463_v15 = vpop.eup %2462  ;;  %v785_v59 = vadd.f32 %v784_v14, %v783_v12  ;;  %v2815_v27 = vmul.f32 4.3429446, %v1011_v16 }
 0x340   : > { %v1017_v18 = vmul.f32 0.6931472, %v2463_v15  ;;  %v1038_v22 = vsel %vm396_vm1, %v2796_v55, -inf }
 0x341   : > { %v787_v23 = vadd.f32 %v786_v19, %v785_v59  ;;  %v1039_v31 = vmax.f32 %v1033_v26, %v1038_v22  ;;  %v1035_v39 = vsel %vm396_vm1, %v2815_v27, -inf }
 0x342   : > { %v2810_v24 = vmul.f32 4.3429446, %v1017_v18 }
 0x343   : > { %v789_v29 = vadd.f32 %v788_v25, %v787_v23  ;;  %v1042_v40 = vmax.f32 %v1037_v36, %v1039_v31 }
 0x344   : > { %v1031_v30 = vsel %vm703_vm2, %v2810_v24, -1e+30 }
 0x345   : > { %790 = vadd.xlane.f32.xlu0 %v789_v29  ;;  %v1040_v35 = vsel %vm396_vm1, %v1031_v30, -inf }
 0x346   : > { %v1041_v37 = vmax.f32 %v1034_v34, %v1040_v35 }
 0x348   : > { %v1043_v41 = vmax.f32 %v1041_v37, %v1035_v39 }
 0x34a   : > { %v1044_v42 = vmax.f32 %v1042_v40, %v1043_v41 }
 0x34c   : > { %1045 = vmax.xlane.f32.xlu1 %v1044_v42 }
 0x3d2   : > { %v791_v43 = vpop.xlane.xlu0 %790 }
 0x3d3   : > { %v792_v45 = vrot.slane %v791_v43, 4 }
 0x3d5   : > { %v793_v46 = vadd.f32 %v792_v45, %v791_v43 }
 0x3d7   : > { %v794_v52 = vrot.slane %v793_v46, 2 }
 0x3d9   : > { %v795_v53 = vadd.f32 %v794_v52, %v793_v46  ;;  %v1046_v33 = vpop.xlane.xlu1 %1045 }
 0x3da   : > { %v1047_v34 = vrot.slane %v1046_v33, 4 }
 0x3db   : > { %v796_v57 = vrot.slane %v795_v53, 1 }
 0x3dc   : > { %v1048_v35 = vmax.f32 %v1046_v33, %v1047_v34 }
 0x3dd   : > { %v797_v60 = vadd.f32 %v796_v57, %v795_v53 }
 0x3de   : > { %v1049_v37 = vrot.slane %v1048_v35, 2 }
 0x3df   : > { %2395 = vpush %v797_v60 }
 0x3e0   : > { %v1050_v39 = vmax.f32 %v1048_v35, %v1049_v37 }
 0x3e2   : > { %v1051_v41 = vrot.slane %v1050_v39, 1 }
 0x3e4   : > { %v1052_v52 = vmax.f32 %v1050_v39, %v1051_v41 }
 0x410   : > { %s2396_s17 = spop %2395 }
 0x411   : > { %s801_s18 = smul.f32 0.00030637256, %s2396_s17 }
 0x413   : > { %v802_v61 = vstv %s801_s18 }
 0x414   : > { %v2830_v32 = vsub.f32 %v2772_v47, %v802_v61  ;;  %v2833_v62 = vsub.f32 %v2775_v48, %v802_v61  ;;  %v2836_v0 = vsub.f32 %v2778_v49, %v802_v61  ;;  %v2839_v44 = vsub.f32 %v2781_v56, %v802_v61 }
 0x415   : > { %v2841_v1 = vsub.f32 %v767_v38, %v802_v61  ;;  %v2849_v5 = vsub.f32 %v769_v51, %v802_v61  ;;  %v2851_v48 = vsub.f32 %v768_v8, %v802_v61 }
 0x416   : > { %v817_v2 = vmul.f32 %v2830_v32, %v2830_v32  ;;  %v818_v4 = vmul.f32 %v2833_v62, %v2833_v62  ;;  %v819_v47 = vmul.f32 %v2836_v0, %v2836_v0  ;;  %v820_v49 = vmul.f32 %v2839_v44, %v2839_v44 }
 0x417   : > { %v821_v9 = vmul.f32 %v2841_v1, %v2841_v1  ;;  %v816_v51 = vsel %vm703_vm2, %v2849_v5, 0.0  ;;  %v822_v8 = vmul.f32 %v2851_v48, %v2851_v48 }
 0x418   : > { %v824_v56 = vsel %vm396_vm1, %v817_v2, 0.0  ;;  %v825_v38 = vsel %vm396_vm1, %v818_v4, 0.0  ;;  %v827_v10 = vsel %vm396_vm1, %v819_v47, 0.0  ;;  %v829_v12 = vsel %vm396_vm1, %v820_v49, 0.0 }
 0x419   : > { %v826_v7 = vadd.f32 %v825_v38, %v824_v56  ;;  %v823_v15 = vmul.f32 %v816_v51, %v816_v51  ;;  %v831_v16 = vsel %vm396_vm1, %v821_v9, 0.0  ;;  %v833_v59 = vsel %vm396_vm1, %v822_v8, 0.0 }
 0x41b   : > { %v828_v11 = vadd.f32 %v827_v10, %v826_v7  ;;  %v835_v19 = vsel %vm396_vm1, %v823_v15, 0.0 }
 0x41d   : > { %v830_v14 = vadd.f32 %v829_v12, %v828_v11 }
 0x41f   : > { %v832_v17 = vadd.f32 %v831_v16, %v830_v14 }
 0x421   : > { %v834_v18 = vadd.f32 %v833_v59, %v832_v17 }
 0x423   : > { %v836_v22 = vadd.f32 %v835_v19, %v834_v18 }
 0x425   : > { %837 = vadd.xlane.f32.xlu0 %v836_v22 }
 0x4b2   : > { %v838_v23 = vpop.xlane.xlu0 %837 }
 0x4b3   : > { %v839_v25 = vrot.slane %v838_v23, 4 }
 0x4b5   : > { %v840_v26 = vadd.f32 %v839_v25, %v838_v23 }
 0x4b7   : > { %v841_v28 = vrot.slane %v840_v26, 2 }
 0x4b9   : > { %v842_v29 = vadd.f32 %v841_v28, %v840_v26 }
 0x4bb   : > { %v843_v30 = vrot.slane %v842_v29, 1 }
 0x4bd   : > { %v844_v31 = vadd.f32 %v843_v30, %v842_v29 }
 0x4bf   : > { %2397 = vpush %v844_v31 }
 0x4f0   : > { %s2398_s19 = spop %2397 }
 0x4f1   : > { %s848_s20 = smul.f32 0.00030646645, %s2398_s19 }
 0x4f3   : > { %v849_v36 = vstv %s848_s20 }
 0x4f4   : > { %2464 = vrsqrt.f32 %v849_v36  ;;  %vm852_vm3 = vcmp.eq.f32.partialorder %v849_v36, inf  ;;  %v855_v43 = vand.u32 2147483648, %v849_v36  ;;  %vm854_vm4 = vcmp.eq.f32.partialorder %v849_v36, 0.0 }
 0x4fe   : > { %v2465_v40 = vpop.eup %2464 }
 0x4ff   : > { %v851_v42 = vmul.f32 %v2465_v40, %v849_v36 }
 0x501   : > { %v853_v45 = vsel %vm852_vm3, %v849_v36, %v851_v42 }
 0x502   : > { %v856_v46 = vsel %vm854_vm4, %v855_v43, %v853_v45 }
 0x503   : > { %2399 = vpush %v856_v46 }
 0x504   : > { %2401 = vpush %v1052_v52 }
 0x534   : > { %s2869_s21 = spop %2399 }
 0x535   : > { %s2402_s22 = spop %2401  ;;  %s858_s30 = sadd.f32 1e-05, %s2869_s21 }
 0x536   : > { %s1854_s23 = sadd.f32 -80.0, %s2402_s22  ;;  %s1831_s21 = sshll.u32 %s3188_s14, 2 }
 0x537   : > { %s380_s16 = scalar_lea.vmem %s3182_s10, %s1831_s21 }
 0x538   : > { %v1055_v53 = vstv %s1854_s23 }
 0x539   : > { %v1056_v57 = vmax.f32 %v2804_v20, %v1055_v53  ;;  %v1057_v60 = vmax.f32 %v2794_v13, %v1055_v53  ;;  %v1058_v61 = vmax.f32 %v2806_v21, %v1055_v53  ;;  %v1059_v2 = vmax.f32 %v2815_v27, %v1055_v53 }
 0x53a   : > { %v1060_v56 = vmax.f32 %v2799_v63, %v1055_v53  ;;  %v1062_v7 = vmax.f32 %v2810_v24, %v1055_v53  ;;  %v1061_v20 = vmax.f32 %v2796_v55, %v1055_v53 }
 0x53b   : > { %v1070_v4 = vsel %vm396_vm1, %v1056_v57, 0.0  ;;  %v1071_v47 = vsel %vm396_vm1, %v1057_v60, 0.0  ;;  %v1073_v38 = vsel %vm396_vm1, %v1058_v61, 0.0  ;;  %v1075_v13 = vsel %vm396_vm1, %v1059_v2, 0.0 }
 0x53c   : > { %v1072_v49 = vadd.f32 %v1071_v47, %v1070_v4  ;;  %v1077_v21 = vsel %vm396_vm1, %v1060_v56, 0.0  ;;  %v1069_v27 = vsel %vm703_vm2, %v1062_v7, 0.0  ;;  %v1079_v11 = vsel %vm396_vm1, %v1061_v20, 0.0 }
 0x53d   : > { %v1081_v63 = vsel %vm396_vm1, %v1069_v27, 0.0 }
 0x53e   : > { %v1074_v9 = vadd.f32 %v1073_v38, %v1072_v49 }
 0x540   : > { %v1076_v10 = vadd.f32 %v1075_v13, %v1074_v9 }
 0x542   : > { %v1078_v51 = vadd.f32 %v1077_v21, %v1076_v10 }
 0x544   : > { %v1080_v8 = vadd.f32 %v1079_v11, %v1078_v51 }
 0x546   : > { %v1082_v12 = vadd.f32 %v1081_v63, %v1080_v8 }
 0x548   : > { %1083 = vadd.xlane.f32.xlu0 %v1082_v12 }
 0x5d5   : > { %v1084_v24 = vpop.xlane.xlu0 %1083 }
 0x5d6   : > { %v1085_v14 = vrot.slane %v1084_v24, 4 }
 0x5d8   : > { %v1086_v15 = vadd.f32 %v1085_v14, %v1084_v24 }
 0x5da   : > { %v1087_v55 = vrot.slane %v1086_v15, 2 }
 0x5dc   : > { %v1088_v16 = vadd.f32 %v1087_v55, %v1086_v15 }
 0x5de   : > { %v1089_v17 = vrot.slane %v1088_v16, 1 }
 0x5e0   : > { %v1090_v59 = vadd.f32 %v1089_v17, %v1088_v16 }
 0x5e2   : > { %2403 = vpush %v1090_v59 }
 0x613   : > { %s2404_s24 = spop %2403 }
 0x614   : > { %s1094_s25 = smul.f32 0.00030637256, %s2404_s24 }
 0x616   : > { %v1095_v18 = vstv %s1094_s25  ;;  %s1830_s25 = sshll.u32 %s3188_s14, 3 }
 0x617   : > { %v1096_v19 = vsub.f32 %v1056_v57, %v1095_v18  ;;  %v1097_v22 = vsub.f32 %v1057_v60, %v1095_v18  ;;  %v1098_v23 = vsub.f32 %v1058_v61, %v1095_v18  ;;  %v1099_v25 = vsub.f32 %v1059_v2, %v1095_v18 }
 0x618   : > { %v1100_v26 = vsub.f32 %v1060_v56, %v1095_v18  ;;  %v1102_v31 = vsub.f32 %v1062_v7, %v1095_v18  ;;  %v1101_v33 = vsub.f32 %v1061_v20, %v1095_v18 }
 0x619   : > { %v1110_v28 = vmul.f32 %v1096_v19, %v1096_v19  ;;  %v1111_v29 = vmul.f32 %v1097_v22, %v1097_v22  ;;  %v1112_v30 = vmul.f32 %v1098_v23, %v1098_v23  ;;  %v1113_v34 = vmul.f32 %v1099_v25, %v1099_v25 }
 0x61a   : > { %v1114_v39 = vmul.f32 %v1100_v26, %v1100_v26  ;;  %v1109_v41 = vsel %vm703_vm2, %v1102_v31, 0.0  ;;  %v1115_v43 = vmul.f32 %v1101_v33, %v1101_v33 }
 0x61b   : > { %v1117_v35 = vsel %vm396_vm1, %v1110_v28, 0.0  ;;  %v1118_v36 = vsel %vm396_vm1, %v1111_v29, 0.0  ;;  %v1120_v40 = vsel %vm396_vm1, %v1112_v30, 0.0  ;;  %v1122_v45 = vsel %vm396_vm1, %v1113_v34, 0.0  ;;  %v1301_v28 = vld [vmem:[%s3177_s5 + $0x18] sm:$0xff]  ;;  %v1302_v30 = vld [vmem:[%s3177_s5 + $0x20] sm:$0xff] }
 0x61c   : > { %v1119_v37 = vadd.f32 %v1118_v36, %v1117_v35  ;;  %v1116_v52 = vmul.f32 %v1109_v41, %v1109_v41  ;;  %v1124_v53 = vsel %vm396_vm1, %v1114_v39, 0.0  ;;  %v1126_v60 = vsel %vm396_vm1, %v1115_v43, 0.0  ;;  %v1304_v34 = vld [vmem:[%s3177_s5 + $0x30] sm:$0xff]  ;;  %v1305_v35 = vld [vmem:[%s3177_s5 + $0x38] sm:$0xff]  ;;  %v1307_v39 = vld [vmem:[%s3177_s5 + $0x48] sm:$0xff] }
 0x61d   : > { %v2316_v36 = vpack.c.bf16 %v1305_v35, %v1304_v34  ;;  %v1308_v41 = vld [vmem:[%s3177_s5 + $0x50] sm:$0xff]  ;;  %v1874_v34 = vld [vmem:[%s3177_s5 + $0xc8] sm:$0xff] }
 0x61e   : > { %v1121_v42 = vadd.f32 %v1120_v40, %v1119_v37  ;;  %v1128_v2 = vsel %vm396_vm1, %v1116_v52, 0.0  ;;  %v1306_v37 = vld [vmem:[%s3177_s5 + $0x40] sm:$0xff] }
 0x61f   : > { %v2320_v40 = vpack.c.bf16 %v1307_v39, %v1306_v37  ;;  %v1876_v37 = vld [vmem:[%s3177_s5 + $0xd8] sm:$0xff] }
 0x620   : > { %v1123_v46 = vadd.f32 %v1122_v45, %v1121_v42  ;;  %v1309_v42 = vld [vmem:[%s3177_s5 + $0x58] sm:$0xff]  ;;  %v1310_v45 = vld [vmem:[%s3177_s5 + $0x60] sm:$0xff] }
 0x621   : > { %v2324_v43 = vpack.c.bf16 %v1309_v42, %v1308_v41  ;;  %v1878_v41 = vld [vmem:[%s3177_s5 + $0xe8] sm:$0xff] }
 0x622   : > { %v1125_v57 = vadd.f32 %v1124_v53, %v1123_v46  ;;  %v1311_v46 = vld [vmem:[%s3177_s5 + $0x68] sm:$0xff]  ;;  %v1312_v53 = vld [vmem:[%s3177_s5 + $0x70] sm:$0xff] }
 0x623   : > { %v2328_v52 = vpack.c.bf16 %v1311_v46, %v1310_v45  ;;  %v1880_v45 = vld [vmem:[%s3177_s5 + $0xf8] sm:$0xff] }
 0x624   : > { %v1127_v61 = vadd.f32 %v1126_v60, %v1125_v57  ;;  %v1313_v57 = vld [vmem:[%s3177_s5 + $0x78] sm:$0xff] }
 0x625   : > { %v2332_v60 = vpack.c.bf16 %v1313_v57, %v1312_v53  ;;  %v1888_v53 = vld [vmem:[%s3177_s5 + $0x108] sm:$0xff] }
 0x626   : > { %v1129_v4 = vadd.f32 %v1128_v2, %v1127_v61  ;;  %v859_v61 = vstv %s858_s30 }
 0x628   : > { %1130 = vadd.xlane.f32.xlu1 %v1129_v4 }
 0x6b5   : > { %v1131_v47 = vpop.xlane.xlu1 %1130 }
 0x6b6   : > { %v1132_v49 = vrot.slane %v1131_v47, 4 }
 0x6b8   : > { %v1133_v58 = vadd.f32 %v1132_v49, %v1131_v47 }
 0x6ba   : > { %v1134_v56 = vrot.slane %v1133_v58, 2 }
 0x6bc   : > { %v1135_v38 = vadd.f32 %v1134_v56, %v1133_v58 }
 0x6be   : > { %v1136_v7 = vrot.slane %v1135_v38, 1 }
 0x6c0   : > { %v1137_v9 = vadd.f32 %v1136_v7, %v1135_v38 }
 0x6c2   : > { %2405 = vpush %v1137_v9 }
 0x6f3   : > { %s2406_s26 = spop %2405 }
 0x6f4   : > { %s1141_s27 = smul.f32 0.00030646645, %s2406_s26 }
 0x6f6   : > { %v1142_v20 = vstv %s1141_s27 }
 0x6f7   : > { %2466 = vrsqrt.f32 %v1142_v20  ;;  %vm1145_vm5 = vcmp.eq.f32.partialorder %v1142_v20, inf  ;;  %v1148_v21 = vand.u32 2147483648, %v1142_v20  ;;  %vm1147_vm6 = vcmp.eq.f32.partialorder %v1142_v20, 0.0 }
 0x701   : > { %v2467_v13 = vpop.eup %2466 }
 0x702   : > { %v1144_v10 = vmul.f32 %v2467_v13, %v1142_v20 }
 0x704   : > { %v1146_v27 = vsel %vm1145_vm5, %v1142_v20, %v1144_v10 }
 0x705   : > { %v1149_v51 = vsel %vm1147_vm6, %v1148_v21, %v1146_v27 }
 0x706   : > { %2407 = vpush %v1149_v51 }
 0x737   : > { %s2408_s28 = spop %2407 }
 0x738   : > { %s1151_s29 = sadd.f32 1e-05, %s2408_s28  ;;  %s376_s28 = scalar_lea.vmem %s3181_s9, %s1830_s25 }
 0x73a   : > { %v1152_v11 = vstv %s1151_s29 }
 0x73b   : > { %2468 = vrcp.f32 %v1152_v11 }
 0x73c   : > { %2470 = vrcp.f32 %v859_v61 }
 0x745   : > { %v2469_v8 = vpop.eup %2468 }
 0x746   : > { %v1156_v63 = vmul.f32 %v2469_v8, %v1098_v23  ;;  %v1157_v12 = vmul.f32 %v2469_v8, %v1099_v25  ;;  %v1154_v24 = vmul.f32 %v2469_v8, %v1096_v19  ;;  %v1155_v14 = vmul.f32 %v2469_v8, %v1097_v22  ;;  %v1196_v23 = vld [vmem:[%s3176_s4] sm:$0xff]  ;;  %v1299_v22 = vld [vmem:[%s3177_s5 + $0x8] sm:$0xff]  ;;  %v1300_v25 = vld [vmem:[%s3177_s5 + $0x10] sm:$0xff]  ;;  %v2471_v2 = vpop.eup %2470 }
 0x747   : > { %v1158_v16 = vmul.f32 %v2469_v8, %v1100_v26  ;;  %v1159_v17 = vmul.f32 %v2469_v8, %v1101_v33  ;;  %v1160_v18 = vmul.f32 %v2469_v8, %v1102_v31  ;;  %2145 = vmatprep.mubr.msk.f32.mxu1 %vm1200_vm7, %v1196_v23  ;;  %v1298_v19 = vld [vmem:[%s3177_s5] sm:$0xff]  ;;  %v2308_v29 = vpack.c.bf16 %v1301_v28, %v1300_v25  ;;  %v1303_v31 = vld [vmem:[%s3177_s5 + $0x28] sm:$0xff]  ;;  %v1868_v23 = vld [vmem:[%s3177_s5 + $0x98] sm:$0xff] }
 0x748   : > { %v2426_v15 = vpack.i.bf16 %v1157_v12, %v1156_v63  ;;  %v2421_v55 = vpack.i.bf16 %v1155_v14, %v1154_v24  ;;  %v2304_v26 = vpack.c.bf16 %v1299_v22, %v1298_v19  ;;  %v2312_v33 = vpack.c.bf16 %v1303_v31, %v1302_v30  ;;  %v1199_v19 = vld [vmem:[%s3176_s4 + $0x18] sm:$0xff]  ;;  %v1869_v25 = vld [vmem:[%s3177_s5 + $0xa0] sm:$0xff] }
 0x749   : > { %v2431_v59 = vpack.i.bf16 %v1159_v17, %v1158_v16  ;;  %v861_v49 = vmul.f32 %v2471_v2, %v2830_v32  ;;  %v862_v58 = vmul.f32 %v2471_v2, %v2833_v62  ;;  %v863_v56 = vmul.f32 %v2471_v2, %v2836_v0  ;;  %v1197_v17 = vld [vmem:[%s3176_s4 + $0x8] sm:$0xff]  ;;  %v1872_v30 = vld [vmem:[%s3177_s5 + $0xb8] sm:$0xff] }
 0x74a   : > { %2427 = vrot.lane.b32.xlu1 %v2426_v15, %s2499_s15  ;;  %2422 = vrot.lane.b32.xlu0 %v2421_v55, %s2499_s15  ;;  %v864_v38 = vmul.f32 %v2471_v2, %v2839_v44  ;;  %v865_v0 = vmul.f32 %v2471_v2, %v2841_v1  ;;  %v866_v44 = vmul.f32 %v2471_v2, %v2851_v48  ;;  %v1865_v1 = vld [vmem:[%s3177_s5 + $0x80] sm:$0xff]  ;;  %v1866_v48 = vld [vmem:[%s3177_s5 + $0x88] sm:$0xff] }
 0x74b   : > { %2305 = vmatprep.subr.bf16.mxu0 %v2304_v26  ;;  %v867_v55 = vmul.f32 %v2471_v2, %v2849_v5  ;;  %v1198_v5 = vld [vmem:[%s3176_s4 + $0x10] sm:$0xff] }
 0x74c   : > { %2307 = vmatpush3.bf16.msra.mxu0 %v2304_v26  ;;  %v1870_v26 = vld [vmem:[%s3177_s5 + $0xa8] sm:$0xff]  ;;  %v1889_v2 = vld [vmem:[%s3177_s5 + $0x110] sm:$0xff] }
 0x74d   : > { %2309 = vmatprep.subr.bf16.mxu0 %v2308_v29  ;;  %v2343_v28 = vpack.c.bf16 %v1870_v26, %v1869_v25 }
 0x74e   : > { %2432 = vrot.lane.b32.xlu1 %v2431_v59, %s2499_s15  ;;  %1180 = vrot.lane.b32.xlu0 %v1160_v18, %s2499_s15  ;;  %v2337_v59 = vpack.c.bf16 %v1866_v48, %v1865_v1  ;;  %v1867_v18 = vld [vmem:[%s3177_s5 + $0x90] sm:$0xff]  ;;  %s1911_s15 = sshll.u32 %s3188_s14, 4 }
 0x74f   : > { %v2340_v22 = vpack.c.bf16 %v1868_v23, %v1867_v18  ;;  %s372_s24 = scalar_lea.vmem %s3180_s8, %s1911_s15 }
 0x750   : > { %2311 = vmatpush3.bf16.msra.mxu0 %v2308_v29  ;;  %v1871_v29 = vld [vmem:[%s3177_s5 + $0xb0] sm:$0xff] }
 0x751   : > { %2313 = vmatprep.subr.bf16.mxu0 %v2312_v33  ;;  %v2346_v31 = vpack.c.bf16 %v1872_v30, %v1871_v29  ;;  %v1397_v29 = vand.u32 127, %v689_v50 }
 0x754   : > { %2315 = vmatpush3.bf16.msra.mxu0 %v2312_v33  ;;  %v1873_v33 = vld [vmem:[%s3177_s5 + $0xc0] sm:$0xff] }
 0x755   : > { %2317 = vmatprep.subr.bf16.mxu0 %v2316_v36  ;;  %v2349_v35 = vpack.c.bf16 %v1874_v34, %v1873_v33 }
 0x758   : > { %2319 = vmatpush3.bf16.msra.mxu0 %v2316_v36  ;;  %v1875_v36 = vld [vmem:[%s3177_s5 + $0xd0] sm:$0xff] }
 0x759   : > { %2321 = vmatprep.subr.bf16.mxu0 %v2320_v40  ;;  %v2352_v39 = vpack.c.bf16 %v1876_v37, %v1875_v36  ;;  %v3116_v36 = vcvt.s32.f32 %v2733_v54 }
 0x75c   : > { %2323 = vmatpush3.bf16.msra.mxu0 %v2320_v40  ;;  %v1877_v40 = vld [vmem:[%s3177_s5 + $0xe0] sm:$0xff] }
 0x75d   : > { %2325 = vmatprep.subr.bf16.mxu0 %v2324_v43  ;;  %v2355_v42 = vpack.c.bf16 %v1878_v41, %v1877_v40  ;;  %v1402_v41 = vand.u32 7, %v1397_v29 }
 0x75f   : > { %vm3125_vm8 = vcmp.eq.s32.totalorder %v1402_v41, 7  ;;  %vm3131_vm9 = vcmp.eq.s32.totalorder %v1402_v41, 6 }
 0x760   : > { %2327 = vmatpush3.bf16.msra.mxu0 %v2324_v43  ;;  %v1879_v43 = vld [vmem:[%s3177_s5 + $0xf0] sm:$0xff] }
 0x761   : > { %2329 = vmatprep.subr.bf16.mxu0 %v2328_v52  ;;  %v2358_v46 = vpack.c.bf16 %v1880_v45, %v1879_v43 }
 0x764   : > { %2331 = vmatpush3.bf16.msra.mxu0 %v2328_v52  ;;  %v1887_v52 = vld [vmem:[%s3177_s5 + $0x100] sm:$0xff] }
 0x765   : > { %2333 = vmatprep.subr.bf16.mxu0 %v2332_v60 }
 0x768   : > { %2335 = vmatpush3.bf16.msra.mxu0 %v2332_v60  ;;  %v2361_v60 = vpack.c.bf16 %v1888_v53, %v1887_v52 }
 0x769   : > { %2360 = vmatprep.subr.bf16.mxu0 %v2496_v3 }
 0x7bc   : > { %v2428_v4 = vpop.permute.xlu1 %2427  ;;  %v2423_v47 = vpop.permute.xlu0 %2422 }
 0x7bd   : > { %v2430_v7 = vunpack.i.h.bf16 %v2428_v4  ;;  %v2429_v9 = vunpack.i.l.bf16 %v2428_v4  ;;  %v2425_v20 = vunpack.i.h.bf16 %v2423_v47  ;;  %v2424_v13 = vunpack.i.l.bf16 %v2423_v47  ;;  %v1890_v4 = vld [vmem:[%s3177_s5 + $0x118] sm:$0xff] }
 0x7be   : > { %v2364_v47 = vpack.c.bf16 %v1890_v4, %v1889_v2 }
 0x7bf   : > { %v1189_v10 = vsel %vm396_vm1, %v861_v49, %v2424_v13  ;;  %v1190_v21 = vsel %vm396_vm1, %v862_v58, %v2425_v20  ;;  %v1191_v27 = vsel %vm396_vm1, %v863_v56, %v2429_v9  ;;  %v1192_v51 = vsel %vm396_vm1, %v864_v38, %v2430_v7  ;;  %v1891_v56 = vld [vmem:[%s3177_s5 + $0x120] sm:$0xff]  ;;  %v1892_v38 = vld [vmem:[%s3177_s5 + $0x128] sm:$0xff]  ;;  %v1894_v9 = vld [vmem:[%s3177_s5 + $0x138] sm:$0xff] }
 0x7c0   : > { %v2433_v11 = vpop.permute.xlu1 %2432  ;;  %v2292_v32 = vpack.c.bf16 %v1190_v21, %v1189_v10  ;;  %v2296_v63 = vpack.c.bf16 %v1192_v51, %v1191_v27  ;;  %v1181_v15 = vpop.permute.xlu0 %1180  ;;  %v2367_v7 = vpack.c.bf16 %v1892_v38, %v1891_v56  ;;  %v1895_v13 = vld [vmem:[%s3177_s5 + $0x140] sm:$0xff]  ;;  %v1896_v10 = vld [vmem:[%s3177_s5 + $0x148] sm:$0xff]  ;;  %v1897_v27 = vld [vmem:[%s3177_s5 + $0x150] sm:$0xff] }
 0x7c1   : > { %v2435_v8 = vunpack.i.h.bf16 %v2433_v11  ;;  %v2434_v62 = vunpack.i.l.bf16 %v2433_v11  ;;  %v1195_v16 = vsel %vm396_vm1, %v867_v55, %v1181_v15  ;;  %v2373_v21 = vpack.c.bf16 %v1896_v10, %v1895_v13  ;;  %v1898_v51 = vld [vmem:[%s3177_s5 + $0x158] sm:$0xff]  ;;  %v1882_v55 = vld [vmem:[%s3178_s6 + $0x1] ss:$0 sm:$0xff] }
 0x7c2   : > { %2293 = vmatprep.subr.bf16.mxu1 %v2292_v32  ;;  %v2376_v11 = vpack.c.bf16 %v1898_v51, %v1897_v27 }
 0x7c3   : > { %2295 = vmatpush3.bf16.msra.mxu1 %v2292_v32  ;;  %v1193_v12 = vsel %vm396_vm1, %v865_v0, %v2434_v62  ;;  %v1194_v24 = vsel %vm396_vm1, %v866_v44, %v2435_v8  ;;  %v1899_v32 = vld [vmem:[%s3177_s5 + $0x160] sm:$0xff]  ;;  %v1900_v8 = vld [vmem:[%s3177_s5 + $0x168] sm:$0xff]  ;;  %v1901_v0 = vld [vmem:[%s3177_s5 + $0x170] sm:$0xff] }
 0x7c4   : > { %2297 = vmatprep.subr.bf16.mxu1 %v2296_v63  ;;  %v2300_v14 = vpack.c.bf16 %v1194_v24, %v1193_v12  ;;  %v2379_v62 = vpack.c.bf16 %v1900_v8, %v1899_v32  ;;  %v1902_v44 = vld [vmem:[%s3177_s5 + $0x178] sm:$0xff]  ;;  %v1859_v12 = vld [vmem:[%s3178_s6] ss:$0 sm:$0xff] }
 0x7c7   : > { %2299 = vmatpush3.bf16.msra.mxu1 %v2296_v63  ;;  %v2382_v63 = vpack.c.bf16 %v1902_v44, %v1901_v0 }
 0x7c8   : > { %2301 = vmatprep.subr.bf16.mxu1 %v2300_v14 }
 0x7cb   : > { %2303 = vmatpush3.bf16.msra.mxu1 %v2300_v14 }
 0x7cc   : > { %2143 = vmatprep.subr.mxu1 %v1195_v16 }
 0x7cf   : > { %2144 = vmatpush3.msra.mxu1 %v1195_v16 }
 0x7d0   : > { %2146 = vmatmul.mubr.msk.f32.vlgmr.msra.gmra.mrb[20].mxu1 %vm1200_vm7, %v1197_v17  ;;  %2336 = vmatprep.subr.bf16.mxu1 %v2496_v3 }
 0x7d1   : > { %2148 = vmatprep.mubr.msk.f32.mxu1 %vm1200_vm7, %v1198_v5  ;;  %2338 = vmatpush3.bf16.msra.mxu1 %v2337_v59 }
 0x7d2   : > { %2339 = vmatprep.subr.bf16.mxu1 %v2496_v3 }
 0x7d4   : > { %2149 = vmatmul.mubr.msk.f32.gmra.mrb[22].mxu1 %vm1200_vm7, %v1199_v19 }
 0x7d5   : > { %2341 = vmatpush3.bf16.msra.mxu1 %v2340_v22  ;;  %2218 = vmatprep.mubr.msk.f32.mxu1 %vm2497_vm0, %v2498_v6 }
 0x7d6   : > { %2342 = vmatprep.subr.bf16.mxu1 %v2496_v3 }
 0x7d9   : > { %2344 = vmatpush3.bf16.msra.mxu1 %v2343_v28  ;;  %v691_v28 = vadd.s32 8, %v2733_v54  ;;  %v1886_v54 = vld [vmem:[%s3179_s7 + $0x1] ss:$0 sm:$0xff] }
 0x7da   : > { %2345 = vmatprep.subr.bf16.mxu1 %v2496_v3 }
 0x7db   : > { %v1413_v33 = vcvt.s32.f32 %v691_v28 }
 0x7dd   : > { %2347 = vmatpush3.bf16.msra.mxu1 %v2346_v31 }
 0x7de   : > { %2348 = vmatprep.subr.bf16.mxu1 %v2496_v3 }
 0x7e1   : > { %2350 = vmatpush3.bf16.msra.mxu1 %v2349_v35  ;;  %v1864_v35 = vld [vmem:[%s3179_s7] ss:$0 sm:$0xff] }
 0x7e2   : > { %2351 = vmatprep.subr.bf16.mxu1 %v2496_v3 }
 0x7e5   : > { %2353 = vmatpush3.bf16.msra.mxu1 %v2352_v39  ;;  %v1904_v39 = vld [vmem:[%s3178_s6 + $0x2] ss:$0 sm:$0xff] }
 0x7e6   : > { %2354 = vmatprep.subr.bf16.mxu1 %v2496_v3 }
 0x7e9   : > { %2356 = vmatpush3.bf16.msra.mxu1 %v2355_v42 }
 0x7ea   : > { %2357 = vmatprep.subr.bf16.mxu1 %v2496_v3 }
 0x7ed   : > { %2359 = vmatpush3.bf16.msra.mxu1 %v2358_v46 }
 0x8a3   : > { %v2147_v57 = vpop.f32.mrb[20].mxu1 }
 0x8a4   : > { %v1279_v61 = vpop.f32.mrb[21].mxu1 }
 0x8a5   : > { %2183 = vmatprep.mubr.f32.mxu0 %v1279_v61 }
 0x8a6   : > { %2184 = vmatmul.mubr.f32.vlgmr.msra.gmra.mrb[22].mxu0 %v2147_v57 }
 0x8a7   : > { %2362 = vmatpush3.bf16.msra.mxu0 %v2361_v60  ;;  %v2150_v49 = vpop.f32.mrb[22].mxu1  ;;  %2253 = vmatprep.mubr.msk.f32.mxu0 %vm2497_vm0, %v2498_v6  ;;  %v1893_v6 = vld [vmem:[%s3177_s5 + $0x130] sm:$0xff] }
 0x8a8   : > { %2363 = vmatprep.subr.bf16.mxu0 %v2496_v3  ;;  %v1289_v58 = vpop.f32.mrb[23].mxu1  ;;  %v2370_v20 = vpack.c.bf16 %v1894_v9, %v1893_v6 }
 0x8a9   : > { %2219 = vmatmul.mubr.f32.vlgmr.msra.gmra.mrb[24].mxu1 %v1289_v58 }
 0x8ab   : > { %2365 = vmatpush3.bf16.msra.mxu0 %v2364_v47 }
 0x8ac   : > { %2366 = vmatprep.subr.bf16.mxu0 %v2496_v3 }
 0x8af   : > { %2368 = vmatpush3.bf16.msra.mxu0 %v2367_v7 }
 0x8b0   : > { %2369 = vmatprep.subr.bf16.mxu0 %v2496_v3 }
 0x8b3   : > { %2371 = vmatpush3.bf16.msra.mxu0 %v2370_v20 }
 0x8b4   : > { %2372 = vmatprep.subr.bf16.mxu0 %v2496_v3 }
 0x8b7   : > { %2374 = vmatpush3.bf16.msra.mxu0 %v2373_v21 }
 0x8b8   : > { %2375 = vmatprep.subr.bf16.mxu0 %v2496_v3 }
 0x8bb   : > { %2377 = vmatpush3.bf16.msra.mxu0 %v2376_v11 }
 0x8bc   : > { %2378 = vmatprep.subr.bf16.mxu0 %v2496_v3 }
 0x8bf   : > { %2380 = vmatpush3.bf16.msra.mxu0 %v2379_v62 }
 0x8c0   : > { %2381 = vmatprep.subr.bf16.mxu0 %v2496_v3 }
 0x8c3   : > { %2383 = vmatpush3.bf16.msra.mxu0 %v2382_v63 }
 0x8c6   : > { %2254 = vmatmul.mubr.f32.vlgmr.msra.gmra.mrb[24].mxu0 %v2150_v49 }
 0x979   : > { %v2185_v24 = vpop.f32.mrb[22].mxu0 }
 0x97a   : > { %v3098_v14 = vadd.f32 %v2185_v24, %v1859_v12  ;;  %v1387_v15 = vpop.f32.mrb[23].mxu0 }
 0x97b   : > { %v3103_v1 = vadd.f32 %v1859_v12, %v1387_v15 }
 0x97c   : > { %v1861_v48 = vmul.f32 -1.442695, %v3098_v14  ;;  %v1551_v16 = vpop.f32.mrb[24].mxu1 }
 0x97d   : > { %v1860_v3 = vmul.f32 -1.442695, %v3103_v1  ;;  %v3107_v17 = vadd.f32 %v1882_v55, %v1551_v16  ;;  %v2220_v59 = vpop.f32.mrb[25].mxu1 }
 0x97e   : > { %2472 = vpow2.f32 %v1861_v48 }
 0x97f   : > { %2474 = vpow2.f32 %v1860_v3  ;;  %v1883_v5 = vmul.f32 -1.442695, %v3107_v17 }
 0x981   : > { %2476 = vpow2.f32 %v1883_v5 }
 0x988   : > { %v2473_v18 = vpop.eup %2472 }
 0x989   : > { %v2475_v23 = vpop.eup %2474  ;;  %v1421_v19 = vadd.f32 1.0, %v2473_v18  ;;  %v1908_v18 = vld [vmem:[%s3179_s7 + $0x2] ss:$0 sm:$0xff] }
 0x98a   : > { %v1420_v22 = vadd.f32 1.0, %v2475_v23 }
 0x98b   : > { %v2477_v25 = vpop.eup %2476  ;;  %2478 = vrcp.f32 %v1421_v19 }
 0x98c   : > { %2480 = vrcp.f32 %v1420_v22  ;;  %v1558_v26 = vadd.f32 1.0, %v2477_v25 }
 0x98e   : > { %2482 = vrcp.f32 %v1558_v26 }
 0x995   : > { %v2479_v30 = vpop.eup %2478 }
 0x996   : > { %v2481_v31 = vpop.eup %2480  ;;  %v1427_v34 = vmul.f32 2.0, %v2479_v30 }
 0x997   : > { %v1426_v37 = vmul.f32 2.0, %v2481_v31 }
 0x998   : > { %v2483_v40 = vpop.eup %2482  ;;  %v1863_v42 = vadd.f32 -0.5, %v1427_v34  ;;  %v1439_v50 = vmul.f32 %v1427_v34, %v1427_v34 }
 0x999   : > { %v1862_v43 = vadd.f32 -0.5, %v1426_v37  ;;  %v1438_v45 = vmul.f32 %v1426_v37, %v1426_v37  ;;  %v1561_v46 = vmul.f32 2.0, %v2483_v40  ;;  %v1673_v52 = vpop.f32.mrb[24].mxu0 }
 0x99a   : > { %v1431_v53 = vadd.f32 %v1863_v42, %v1413_v33  ;;  %v1448_v57 = vmul.f32 %v1864_v35, %v1439_v50  ;;  %v1674_v60 = vadd.f32 %v1904_v39, %v1673_v52  ;;  %v2255_v61 = vpop.f32.mrb[25].mxu0 }
 0x99b   : > { %v1430_v2 = vadd.f32 %v1862_v43, %v3116_v36  ;;  %v1447_v4 = vmul.f32 %v1864_v35, %v1438_v45  ;;  %v1884_v47 = vadd.f32 -0.5, %v1561_v46  ;;  %v1567_v49 = vmul.f32 %v1561_v46, %v1561_v46 }
 0x99c   : > { %v1433_v56 = vmul.f32 0.11764706, %v1431_v53  ;;  %v1450_v38 = vmax.f32 %v1448_v57, 0.0  ;;  %v1905_v7 = vmul.f32 -1.442695, %v1674_v60 }
 0x99d   : > { %v1432_v6 = vmul.f32 0.11764706, %v1430_v2  ;;  %v1449_v9 = vmax.f32 %v1447_v4, 0.0  ;;  %v1563_v20 = vadd.f32 %v1884_v47, %v3116_v36  ;;  %v1576_v13 = vmul.f32 %v1886_v54, %v1567_v49 }
 0x99e   : > { %v1435_v21 = vmax.f32 %v1433_v56, 0.0  ;;  %v1452_v27 = vmin.f32 %v1450_v38, 2.0  ;;  %2484 = vpow2.f32 %v1905_v7 }
 0x99f   : > { %v1434_v51 = vmax.f32 %v1432_v6, 0.0  ;;  %v1451_v11 = vmin.f32 %v1449_v9, 2.0  ;;  %v1564_v32 = vmul.f32 0.23529412, %v1563_v20  ;;  %v1577_v8 = vmax.f32 %v1576_v13, 0.0 }
 0x9a0   : > { %v1437_v62 = vmin.f32 %v1435_v21, 2.0  ;;  %v1454_v0 = vsel %vm3125_vm8, %v1452_v27, %v3098_v14 }
 0x9a1   : > { %v1436_v44 = vmin.f32 %v1434_v51, 2.0  ;;  %v1453_v63 = vsel %vm3125_vm8, %v1451_v11, %v3103_v1  ;;  %v1565_v12 = vmax.f32 %v1564_v32, 0.0  ;;  %v1578_v24 = vmin.f32 %v1577_v8, 2.0 }
 0x9a2   : > { %v1456_v15 = vsel %vm3131_vm9, %v1437_v62, %v1454_v0 }
 0x9a3   : > { %1459 = vst.msk [vmem:[%s372_s24 + $0x8] sm:$0xff] %vm1457_vm10, %v1456_v15  ;;  %v1455_v55 = vsel %vm3131_vm9, %v1436_v44, %v1453_v63  ;;  %v1566_v14 = vmin.f32 %v1565_v12, 2.0  ;;  %v1579_v48 = vsel %vm3125_vm8, %v1578_v24, %v3107_v17 }
 0x9a4   : > { %1458 = vst.msk [vmem:[%s372_s24] sm:$0xff] %vm1457_vm10, %v1455_v55 }
 0x9a5   : > { %v1580_v1 = vsel %vm3131_vm9, %v1566_v14, %v1579_v48 }
 0x9a6   : > { %1581 = vst.msk [vmem:[%s376_s28] sm:$0xff] %vm1457_vm10, %v1580_v1 }
 0x9a8   : > { %v2485_v16 = vpop.eup %2484 }
 0x9a9   : > { %v1680_v3 = vadd.f32 1.0, %v2485_v16 }
 0x9ab   : > { %2486 = vrcp.f32 %v1680_v3 }
 0x9b5   : > { %v2487_v59 = vpop.eup %2486 }
 0x9b6   : > { %v1683_v5 = vmul.f32 2.0, %v2487_v59 }
 0x9b8   : > { %v1906_v23 = vadd.f32 -0.5, %v1683_v5  ;;  %v1689_v19 = vmul.f32 %v1683_v5, %v1683_v5 }
 0x9ba   : > { %v1685_v22 = vadd.f32 %v1906_v23, %v3116_v36  ;;  %v1698_v17 = vmul.f32 %v1908_v18, %v1689_v19 }
 0x9bc   : > { %v1686_v25 = vmul.f32 0.47058824, %v1685_v22  ;;  %v1699_v26 = vmax.f32 %v1698_v17, 0.0 }
 0x9be   : > { %v1687_v28 = vmax.f32 %v1686_v25, 0.0  ;;  %v1700_v29 = vmin.f32 %v1699_v26, 2.0 }
 0x9c0   : > { %v1688_v30 = vmin.f32 %v1687_v28, 2.0  ;;  %v1701_v31 = vsel %vm3125_vm8, %v1700_v29, %v1674_v60 }
 0x9c2   : > { %v1702_v33 = vsel %vm3131_vm9, %v1688_v30, %v1701_v31 }
 0x9c3   : > { %1704 = vst.msk [vmem:[%s380_s16] sm:$0xf] %vm1703_vm11, %v1702_v33 }
 0x9c4 PF: > { %s21_s13 = sadd.s32 1, %s2494_s13  }
 0x9c5   : > { %p18_p4 = scmp.ge.s32.totalorder %s21_s13, 4  }
 0x9c7   :  { %20 = sbr.rel (!%p18_p4) target bundleno = 1 (0x1), region = 112 }

</bundles_post_ra>
